<compile_context>
chip_gen: v7x
topology: tpu7x:2x2x1
jax: 0.10.0
libtpu: 0.0.40
codegen_flags: <defaults>
</compile_context>

<pallas_src>
import jax
import jax.numpy as jnp
from jax import lax
from jax.experimental import pallas as pl
from jax.experimental.pallas import tpu as pltpu

EPS = 1e-5


# ----------------------------- chip / budget helpers -----------------------------

def _tpu_vmem_capacity_bytes():
    try:
        info = pltpu.get_tpu_info()
        cap = getattr(info, "vmem_capacity_bytes", None)
        if cap:
            return int(cap)
    except Exception:
        pass
    return 128 * 1024 * 1024


def _mxu_contraction_depth():
    """MXU contraction depth: 128 on v4/v5-class parts, 256 on v6e/v7x."""
    try:
        kind = jax.devices()[0].device_kind.lower()
    except Exception:
        kind = ""
    if any(tag in kind for tag in ("v2", "v3", "v4", "v5")):
        return 128
    return 256


def _choose_conv_block_h(N, H, W, Cin, Cout, KH, KW, budget_bytes,
                         block_h=None, min_steps=4):
    """H tile for the conv pass: any divisor of H, sized from a VMEM budget."""
    if block_h is None:
        Wp = W + KW - 1
        fixed = KH * KW * Cin * Cout * 2 * 2                # weights (bf16, dbuf)
        per_row = (4 * Wp * Cin                             # x block, bf16 double-buffered
                   + 2 * Wp * Cin                           # bf16 slab value
                   + 2 * W * KW * Cin                       # shifted windows / folded patches
                   + 12 * W * Cout)                         # y block (bf16 dbuf) + fp32 acc/temps
        block_h = max(1, (budget_bytes - fixed) // max(1, per_row))
        if N < min_steps:                                   # keep both TCs busy (v7x)
            block_h = min(block_h, max(1, (N * H) // min_steps))
    block_h = max(1, min(block_h, H))
    for t in range(block_h, 0, -1):
        if H % t == 0:
            return t
    return 1


def _choose_bn_block_h(H, W, c_blk, budget_bytes, out_bytes):
    """H tile for the BN+ReLU pass (no halos): keep the out lane dim 128-aligned."""
    per_row = W * c_blk * (4 + 4 + 2 + 4 + 2 * out_bytes)
    block_h = max(1, min(H, budget_bytes // max(1, per_row)))
    for t in range(block_h, 0, -1):
        if H % t == 0 and (t == H or (t * W) % 128 == 0):
            return t
    return H


# ----------------------------------- kernels -------------------------------------

def _make_conv_stats_kernel(TH, W, Cin, Cout, KH, KW, n_h, fold_kw):
    """Conv(3x3, 'same', stride 1) on one (TH, W) row tile + fp32 partial stats."""

    def kernel(x_ref, top_ref, bot_ref, w_ref, b_ref, y_ref, sum_ref, sq_ref):
        h = pl.program_id(1)

        # bf16 H-halo'd slab (TH+KH-1, Wp, Cin).  x arrives already W-padded and
        # bf16; the one-row halos above/below are separate single-row inputs,
        # masked (still in bf16) at the image border.  No fp32 round trip.
        x_mid = x_ref[0]                                             # (TH,  Wp, Cin)
        zero_row = jnp.zeros_like(top_ref[0])
        top = jnp.where(h > 0, top_ref[0], zero_row)                 # (1,   Wp, Cin)
        bot = jnp.where(h < n_h - 1, bot_ref[0], zero_row)           # (1,   Wp, Cin)
        slab = jnp.concatenate([top, x_mid, bot], axis=0)            # (TH+2, Wp, Cin)

        # Shifted W windows built ONCE per tile and reused by every kh tap
        # (3 shifts per tile instead of KH*KW slice copies).
        windows = [slab[:, kw:kw + W, :] for kw in range(KW)]        # each (TH+2, W, Cin)

        # fp32 accumulation in a local value (no per-tap VMEM read-modify-write).
        acc = None
        if fold_kw:
            # K = KW*Cin deep contraction: KH matmuls instead of KH*KW.
            patches = jnp.concatenate(windows, axis=-1)              # (TH+2, W, KW*Cin)
            for kh in range(KH):
                part = lax.dot_general(
                    patches[kh:kh + TH], w_ref[kh],
                    dimension_numbers=(((2,), (0,)), ((), ())),
                    preferred_element_type=jnp.float32)
                acc = part if acc is None else acc + part
        else:
            for kh in range(KH):
                for kw in range(KW):
                    part = lax.dot_general(
                        windows[kw][kh:kh + TH], w_ref[kh, kw],
                        dimension_numbers=(((2,), (0,)), ((), ())),
                        preferred_element_type=jnp.float32)
                    acc = part if acc is None else acc + part

        acc = acc + b_ref[0][None, None, :]                          # fp32 (TH, W, Cout)
        y_ref[0] = acc.astype(y_ref.dtype)                           # bf16 store

        # fp32 partial batch statistics for this (n, h) tile, taken from the
        # fp32 accumulator (before the bf16 downcast of y).
        sum_ref[0] = jnp.sum(acc, axis=(0, 1)).reshape(1, Cout)
        sq_ref[0] = jnp.sum(acc * acc, axis=(0, 1)).reshape(1, Cout)

    return kernel


def _make_bn_relu_nchw_kernel(TH, W, c_blk):
    """y*scale + shift, ReLU, NHWC->NCHW tile transpose via a bf16 identity matmul."""
    M = TH * W

    def kernel(y_ref, scale_ref, shift_ref, eye_ref, o_ref):
        y = y_ref[0].astype(jnp.float32)                             # (TH, W, c_blk)
        z = jnp.maximum(
            y * scale_ref[0][None, None, :] + shift_ref[0][None, None, :], 0.0)
        z2 = z.reshape(M, c_blk).astype(jnp.bfloat16)
        # NHWC -> NCHW tile transpose on the MXU via a bf16 identity matrix
        # (exact, fp32 accumulate) -- hidden under the HBM-bound DMA of this pass.
        o_ref[0] = lax.dot_general(
            eye_ref[...], z2,
            dimension_numbers=(((1,), (1,)), ((), ())),
            preferred_element_type=jnp.float32).astype(o_ref.dtype)  # (c_blk, TH*W)

    return kernel


# ---------------------------------- forward --------------------------------------

def basic_conv_forward(x_nchw, w_oihw, bias, gamma, beta, block_h=None,
                       out_dtype=jnp.bfloat16):
    """Forward of basicConv (stride=1): Conv2d(3x3, pad=1) + BatchNorm2d(train) + ReLU."""
    N, Cin, H, W = x_nchw.shape
    Cout, Cin_w, KH, KW = w_oihw.shape
    assert Cin_w == Cin and KH == KW and KH % 2 == 1
    pad = (KH - 1) // 2
    Wp = W + 2 * pad

    # Per-chip VMEM budget: ~96 MiB scoped on 128-MiB parts (v5e/v6e), ~48 MiB on
    # 64-MiB parts (v7x); tile budget leaves headroom for double buffering.
    vmem_cap = _tpu_vmem_capacity_bytes()
    vmem_limit = min(96 * 1024 * 1024, (3 * vmem_cap) // 4)
    tile_budget = vmem_limit // 3

    # TODO(synk): the NCHW->NHWC transpose / W-pad / bf16 cast of x is still one
    # XLA pre-pass (extra read+write of x in HBM); folding it into the conv kernel
    # would need W halos handled like the H halos.
    x_nhwc = jnp.pad(jnp.transpose(x_nchw, (0, 2, 3, 1)),
                     ((0, 0), (0, 0), (pad, pad), (0, 0))).astype(jnp.bfloat16)
    b2d = bias.reshape(1, Cout).astype(jnp.float32)

    TH = _choose_conv_block_h(N, H, W, Cin, Cout, KH, KW, tile_budget, block_h)
    n_h = H // TH

    # Fold the KW taps into the contraction only when the folded depth still fits
    # the MXU (fewer issues); never when Cin alone already fills the depth.
    fold_kw = (KW * Cin) <= _mxu_contraction_depth()
    if fold_kw:
        w_k = jnp.transpose(w_oihw, (2, 3, 1, 0)).reshape(
            KH, KW * Cin, Cout).astype(jnp.bfloat16)
        w_spec = pl.BlockSpec((KH, KW * Cin, Cout), lambda n, h: (0, 0, 0))
    else:
        w_k = jnp.transpose(w_oihw, (2, 3, 1, 0)).astype(jnp.bfloat16)  # (KH,KW,Cin,Cout)
        w_spec = pl.BlockSpec((KH, KW, Cin, Cout), lambda n, h: (0, 0, 0, 0))

    conv_kernel = _make_conv_stats_kernel(TH, W, Cin, Cout, KH, KW, n_h, fold_kw)
    conv_cost = pl.CostEstimate(
        flops=2 * N * H * W * KH * KW * Cin * Cout,
        transcendentals=0,
        bytes_accessed=(N * H * Wp * Cin * 2 + KH * KW * Cin * Cout * 2
                        + N * H * W * Cout * 2 + 2 * N * n_h * Cout * 4))

    y, part_sum, part_sq = pl.pallas_call(
        conv_kernel,
        out_shape=(
            jax.ShapeDtypeStruct((N, H, W, Cout), jnp.bfloat16),
            jax.ShapeDtypeStruct((N * n_h, 1, Cout), jnp.float32),
            jax.ShapeDtypeStruct((N * n_h, 1, Cout), jnp.float32),
        ),
        grid_spec=pltpu.PrefetchScalarGridSpec(
            num_scalar_prefetch=0,
            grid=(N, n_h),
            in_specs=[
                pl.BlockSpec((1, TH, Wp, Cin), lambda n, h: (n, h, 0, 0)),
                pl.BlockSpec((1, 1, Wp, Cin),
                             lambda n, h: (n, jnp.maximum(h * TH - 1, 0), 0, 0)),
                pl.BlockSpec((1, 1, Wp, Cin),
                             lambda n, h: (n, jnp.minimum(h * TH + TH, H - 1), 0, 0)),
                w_spec,
                pl.BlockSpec((1, Cout), lambda n, h: (0, 0)),
            ],
            out_specs=[
                pl.BlockSpec((1, TH, W, Cout), lambda n, h: (n, h, 0, 0)),
                pl.BlockSpec((1, 1, Cout), lambda n, h: (n * n_h + h, 0, 0)),
                pl.BlockSpec((1, 1, Cout), lambda n, h: (n * n_h + h, 0, 0)),
            ],
        ),
        compiler_params=pltpu.CompilerParams(
            dimension_semantics=("parallel", "parallel"),
            vmem_limit_bytes=vmem_limit),
        cost_estimate=conv_cost,
    )(x_nhwc, x_nhwc, x_nhwc, w_k, b2d)

    # BatchNorm2d training-mode statistics (biased variance) reduced in plain JAX
    # from the tiny fp32 per-tile partials.
    # TODO(synk): E[x^2]-mean^2 cancels badly if per-channel means dominate the std;
    # a centered / Welford-style partial reduction would be more robust.
    count = float(N * H * W)
    ch_sum = jnp.sum(part_sum, axis=(0, 1))
    ch_sq = jnp.sum(part_sq, axis=(0, 1))
    mean = ch_sum / count
    var = jnp.maximum(ch_sq / count - mean * mean, 0.0)
    inv = gamma.astype(jnp.float32) / jnp.sqrt(var + EPS)
    scale = inv.reshape(1, Cout)
    shift = (beta.astype(jnp.float32) - mean * inv).reshape(1, Cout)

    # BN + ReLU + NCHW write: its own (larger) H tile and up-to-256-wide channel block.
    if Cout % 256 == 0:
        c_blk = 256
    elif Cout % 128 == 0:
        c_blk = 128
    else:
        c_blk = Cout
    n_c = Cout // c_blk

    out_bytes = jnp.dtype(out_dtype).itemsize
    THB = _choose_bn_block_h(H, W, c_blk, tile_budget, out_bytes)
    n_hb = H // THB

    eye_mat = jnp.eye(c_blk, dtype=jnp.bfloat16)
    bn_kernel = _make_bn_relu_nchw_kernel(THB, W, c_blk)
    bn_cost = pl.CostEstimate(
        flops=N * H * W * Cout * (3 + 2 * c_blk),
        transcendentals=0,
        bytes_accessed=N * H * W * Cout * (2 + out_bytes) + 2 * Cout * 4)

    out_flat = pl.pallas_call(
        bn_kernel,
        out_shape=jax.ShapeDtypeStruct((N, Cout, H * W), out_dtype),
        grid_spec=pltpu.PrefetchScalarGridSpec(
            num_scalar_prefetch=0,
            grid=(N, n_hb, n_c),
            in_specs=[
                pl.BlockSpec((1, THB, W, c_blk), lambda n, h, c: (n, h, 0, c)),
                pl.BlockSpec((1, c_blk), lambda n, h, c: (0, c)),
                pl.BlockSpec((1, c_blk), lambda n, h, c: (0, c)),
                pl.BlockSpec((c_blk, c_blk), lambda n, h, c: (0, 0)),
            ],
            out_specs=pl.BlockSpec((1, c_blk, THB * W), lambda n, h, c: (n, c, h)),
        ),
        compiler_params=pltpu.CompilerParams(
            dimension_semantics=("parallel", "parallel", "parallel"),
            vmem_limit_bytes=vmem_limit),
        cost_estimate=bn_cost,
    )(y, scale, shift, eye_mat)

    # (N, Cout, H*W) is already NCHW-contiguous: this reshape is free metadata.
    return out_flat.reshape(N, Cout, H, W)


def _reference(x_nchw, w_oihw, bias, gamma, beta):
    """Pure-JAX fp32 reference (matches the PyTorch forward in training mode)."""
    y = lax.conv_general_dilated(
        x_nchw.astype(jnp.float32), w_oihw.astype(jnp.float32),
        window_strides=(1, 1), padding=((1, 1), (1, 1)),
        dimension_numbers=("NCHW", "OIHW", "NCHW"))
    y = y + bias.reshape(1, -1, 1, 1)
    mean = jnp.mean(y, axis=(0, 2, 3), keepdims=True)
    var = jnp.var(y, axis=(0, 2, 3), keepdims=True)          # biased, like BN train
    y = (y - mean) / jnp.sqrt(var + EPS)
    y = y * gamma.reshape(1, -1, 1, 1) + beta.reshape(1, -1, 1, 1)
    return jnp.maximum(y, 0.0)


if __name__ == "__main__":
    # Small shapes consistent with the module (defaults 192->128, scaled down).
    N, Cin, Cout, H, W, K = 2, 4, 8, 16, 16, 3

    key = jax.random.PRNGKey(0)
    kx, kw_, kb = jax.random.split(key, 3)
    x = jax.random.normal(kx, (N, Cin, H, W), dtype=jnp.float32)
    w = jax.random.normal(kw_, (Cout, Cin, K, K), dtype=jnp.float32) * 0.1
    b = jax.random.normal(kb, (Cout,), dtype=jnp.float32) * 0.1
    gamma = jnp.ones((Cout,), jnp.float32)   # PyTorch BatchNorm2d default init
    beta = jnp.zeros((Cout,), jnp.float32)

    ref = _reference(x, w, b, gamma, beta)

    # Auto tile (TH=8 here -> exercises the H-halo path) and a forced full-H tile.
    out_auto = jax.block_until_ready(basic_conv_forward(x, w, b, gamma, beta))
    out_full = jax.block_until_ready(
        basic_conv_forward(x, w, b, gamma, beta, block_h=H))

    assert out_auto.shape == (N, Cout, H, W)
    assert out_full.shape == (N, Cout, H, W)
    # bf16 storage/compute + bf16 output -> relaxed tolerance vs the fp32 reference.
    assert jnp.allclose(out_auto.astype(jnp.float32), ref, atol=8e-2, rtol=8e-2), \
        "auto-tiled mismatch vs reference"
    assert jnp.allclose(out_full.astype(jnp.float32), ref, atol=8e-2, rtol=8e-2), \
        "full-tile mismatch vs reference"

    print("KERNEL_OK")
</pallas_src>

<mosaic_0001>
module attributes {stable_mosaic.version = 11 : i64} {
  func.func @kernel(%arg0: i32, %arg1: i32, %arg2: memref<1x8x18x4xbf16, #tpu.memory_space<vmem>>, %arg3: memref<1x1x18x4xbf16, #tpu.memory_space<vmem>>, %arg4: memref<1x1x18x4xbf16, #tpu.memory_space<vmem>>, %arg5: memref<3x12x8xbf16, #tpu.memory_space<vmem>>, %arg6: memref<1x8xf32, #tpu.memory_space<vmem>>, %arg7: memref<1x8x16x8xbf16, #tpu.memory_space<vmem>>, %arg8: memref<1x1x8xf32, #tpu.memory_space<vmem>>, %arg9: memref<1x1x8xf32, #tpu.memory_space<vmem>>) attributes {dimension_semantics = [#tpu.dimension_semantics<parallel>, #tpu.dimension_semantics<parallel>], iteration_bounds = array<i64: 2, 2>, scalar_prefetch = 0 : i64, scratch_operands = 0 : i64, tpu.core_type = #tpu.core_type<tc>, window_params = [{transform_indices = @transform_0, window_bounds = array<i64: 1, 8, 18, 4>}, {transform_indices = @transform_1, window_bounds = array<i64: 1, 1, 18, 4>}, {transform_indices = @transform_2, window_bounds = array<i64: 1, 1, 18, 4>}, {pipeline_mode = #tpu.pipeline_mode<synchronous>, transform_indices = @transform_3, window_bounds = array<i64: 3, 12, 8>}, {pipeline_mode = #tpu.pipeline_mode<synchronous>, transform_indices = @transform_4, window_bounds = array<i64: 1, 8>}, {transform_indices = @transform_5, window_bounds = array<i64: 1, 8, 16, 8>}, {transform_indices = @transform_6, window_bounds = array<i64: 1, 1, 8>}, {transform_indices = @transform_7, window_bounds = array<i64: 1, 1, 8>}]} {
    %c0 = arith.constant 0 : index
    %c0_0 = arith.constant 0 : index
    %c0_1 = arith.constant 0 : index
    %c0_2 = arith.constant 0 : index
    %0 = vector.load %arg2[%c0, %c0_0, %c0_1, %c0_2] : memref<1x8x18x4xbf16, #tpu.memory_space<vmem>>, vector<1x8x18x4xbf16>
    %1 = vector.shape_cast %0 : vector<1x8x18x4xbf16> to vector<8x18x4xbf16>
    %cst = arith.constant 0.000000e+00 : bf16
    %2 = vector.broadcast %cst : bf16 to vector<1x18x4xbf16>
    %c0_i32 = arith.constant 0 : i32
    %3 = arith.cmpi sgt, %arg1, %c0_i32 : i32
    %c0_3 = arith.constant 0 : index
    %c0_4 = arith.constant 0 : index
    %c0_5 = arith.constant 0 : index
    %c0_6 = arith.constant 0 : index
    %4 = vector.load %arg3[%c0_3, %c0_4, %c0_5, %c0_6] : memref<1x1x18x4xbf16, #tpu.memory_space<vmem>>, vector<1x1x18x4xbf16>
    %5 = vector.shape_cast %4 : vector<1x1x18x4xbf16> to vector<1x18x4xbf16>
    %6 = arith.select %3, %5, %2 : vector<1x18x4xbf16>
    %c1_i32 = arith.constant 1 : i32
    %7 = arith.cmpi slt, %arg1, %c1_i32 : i32
    %c0_7 = arith.constant 0 : index
    %c0_8 = arith.constant 0 : index
    %c0_9 = arith.constant 0 : index
    %c0_10 = arith.constant 0 : index
    %8 = vector.load %arg4[%c0_7, %c0_8, %c0_9, %c0_10] : memref<1x1x18x4xbf16, #tpu.memory_space<vmem>>, vector<1x1x18x4xbf16>
    %9 = vector.shape_cast %8 : vector<1x1x18x4xbf16> to vector<1x18x4xbf16>
    %10 = arith.select %7, %9, %2 : vector<1x18x4xbf16>
    %11 = tpu.concatenate %6, %1, %10 in 0 : vector<1x18x4xbf16>, vector<8x18x4xbf16>, vector<1x18x4xbf16> -> vector<10x18x4xbf16>
    %12 = vector.extract_strided_slice %11 {offsets = [0, 0, 0], sizes = [10, 16, 4], strides = [1, 1, 1]} : vector<10x18x4xbf16> to vector<10x16x4xbf16>
    %13 = vector.extract_strided_slice %11 {offsets = [0, 1, 0], sizes = [10, 16, 4], strides = [1, 1, 1]} : vector<10x18x4xbf16> to vector<10x16x4xbf16>
    %14 = vector.extract_strided_slice %11 {offsets = [0, 2, 0], sizes = [10, 16, 4], strides = [1, 1, 1]} : vector<10x18x4xbf16> to vector<10x16x4xbf16>
    %15 = tpu.concatenate %12, %13, %14 in 2 : vector<10x16x4xbf16>, vector<10x16x4xbf16>, vector<10x16x4xbf16> -> vector<10x16x12xbf16>
    %16 = vector.extract_strided_slice %15 {offsets = [0, 0, 0], sizes = [8, 16, 12], strides = [1, 1, 1]} : vector<10x16x12xbf16> to vector<8x16x12xbf16>
    %c0_11 = arith.constant 0 : index
    %c0_12 = arith.constant 0 : index
    %c0_13 = arith.constant 0 : index
    %17 = vector.load %arg5[%c0_11, %c0_12, %c0_13] : memref<3x12x8xbf16, #tpu.memory_space<vmem>>, vector<1x12x8xbf16>
    %18 = vector.shape_cast %17 : vector<1x12x8xbf16> to vector<12x8xbf16>
    %cst_14 = arith.constant dense<0.000000e+00> : vector<8x16x8xf32>
    %19 = tpu.matmul %16, %18, %cst_14 {dimension_numbers = #tpu.dot_dimension_numbers<[2], [0], [0, 1], [1], [0, 0, 0, 1, 1, 1], [], []>} : vector<8x16x12xbf16>, vector<12x8xbf16>, vector<8x16x8xf32> -> vector<8x16x8xf32>
    %20 = vector.extract_strided_slice %15 {offsets = [1, 0, 0], sizes = [8, 16, 12], strides = [1, 1, 1]} : vector<10x16x12xbf16> to vector<8x16x12xbf16>
    %c1 = arith.constant 1 : index
    %c0_15 = arith.constant 0 : index
    %c0_16 = arith.constant 0 : index
    %21 = vector.load %arg5[%c1, %c0_15, %c0_16] : memref<3x12x8xbf16, #tpu.memory_space<vmem>>, vector<1x12x8xbf16>
    %22 = vector.shape_cast %21 : vector<1x12x8xbf16> to vector<12x8xbf16>
    %cst_17 = arith.constant dense<0.000000e+00> : vector<8x16x8xf32>
    %23 = tpu.matmul %20, %22, %cst_17 {dimension_numbers = #tpu.dot_dimension_numbers<[2], [0], [0, 1], [1], [0, 0, 0, 1, 1, 1], [], []>} : vector<8x16x12xbf16>, vector<12x8xbf16>, vector<8x16x8xf32> -> vector<8x16x8xf32>
    %24 = arith.addf %19, %23 : vector<8x16x8xf32>
    %25 = vector.extract_strided_slice %15 {offsets = [2, 0, 0], sizes = [8, 16, 12], strides = [1, 1, 1]} : vector<10x16x12xbf16> to vector<8x16x12xbf16>
    %c2 = arith.constant 2 : index
    %c0_18 = arith.constant 0 : index
    %c0_19 = arith.constant 0 : index
    %26 = vector.load %arg5[%c2, %c0_18, %c0_19] : memref<3x12x8xbf16, #tpu.memory_space<vmem>>, vector<1x12x8xbf16>
    %27 = vector.shape_cast %26 : vector<1x12x8xbf16> to vector<12x8xbf16>
    %cst_20 = arith.constant dense<0.000000e+00> : vector<8x16x8xf32>
    %28 = tpu.matmul %25, %27, %cst_20 {dimension_numbers = #tpu.dot_dimension_numbers<[2], [0], [0, 1], [1], [0, 0, 0, 1, 1, 1], [], []>} : vector<8x16x12xbf16>, vector<12x8xbf16>, vector<8x16x8xf32> -> vector<8x16x8xf32>
    %29 = arith.addf %24, %28 : vector<8x16x8xf32>
    %c0_21 = arith.constant 0 : index
    %c0_22 = arith.constant 0 : index
    %30 = vector.load %arg6[%c0_21, %c0_22] : memref<1x8xf32, #tpu.memory_space<vmem>>, vector<1x8xf32>
    %31 = vector.shape_cast %30 : vector<1x8xf32> to vector<8xf32>
    %32 = vector.shape_cast %31 : vector<8xf32> to vector<1x1x8xf32>
    %33 = vector.broadcast %32 : vector<1x1x8xf32> to vector<8x16x8xf32>
    %34 = arith.addf %29, %33 : vector<8x16x8xf32>
    %35 = arith.truncf %34 : vector<8x16x8xf32> to vector<8x16x8xbf16>
    %c0_23 = arith.constant 0 : index
    %c0_24 = arith.constant 0 : index
    %c0_25 = arith.constant 0 : index
    %c0_26 = arith.constant 0 : index
    %36 = vector.load %arg7[%c0_23, %c0_24, %c0_25, %c0_26] : memref<1x8x16x8xbf16, #tpu.memory_space<vmem>>, vector<1x8x16x8xbf16>
    %37 = vector.shape_cast %36 : vector<1x8x16x8xbf16> to vector<8x16x8xbf16>
    %38 = vector.shape_cast %35 : vector<8x16x8xbf16> to vector<1x8x16x8xbf16>
    tpu.vector_store %arg7[%c0_23, %c0_24, %c0_25, %c0_26], %38 {strides = array<i32>} : memref<1x8x16x8xbf16, #tpu.memory_space<vmem>>, vector<1x8x16x8xbf16>,
    %cst_27 = arith.constant dense<0.000000e+00> : vector<8xf32>
    %39 = vector.multi_reduction <add>, %34, %cst_27 [0, 1] : vector<8x16x8xf32> to vector<8xf32>
    %40 = vector.shape_cast %39 : vector<8xf32> to vector<1x8xf32>
    %c0_28 = arith.constant 0 : index
    %c0_29 = arith.constant 0 : index
    %c0_30 = arith.constant 0 : index
    %41 = vector.load %arg8[%c0_28, %c0_29, %c0_30] : memref<1x1x8xf32, #tpu.memory_space<vmem>>, vector<1x1x8xf32>
    %42 = vector.shape_cast %41 : vector<1x1x8xf32> to vector<1x8xf32>
    %43 = vector.shape_cast %40 : vector<1x8xf32> to vector<1x1x8xf32>
    tpu.vector_store %arg8[%c0_28, %c0_29, %c0_30], %43 {strides = array<i32>} : memref<1x1x8xf32, #tpu.memory_space<vmem>>, vector<1x1x8xf32>,
    %44 = arith.mulf %34, %34 : vector<8x16x8xf32>
    %cst_31 = arith.constant dense<0.000000e+00> : vector<8xf32>
    %45 = vector.multi_reduction <add>, %44, %cst_31 [0, 1] : vector<8x16x8xf32> to vector<8xf32>
    %46 = vector.shape_cast %45 : vector<8xf32> to vector<1x8xf32>
    %c0_32 = arith.constant 0 : index
    %c0_33 = arith.constant 0 : index
    %c0_34 = arith.constant 0 : index
    %47 = vector.load %arg9[%c0_32, %c0_33, %c0_34] : memref<1x1x8xf32, #tpu.memory_space<vmem>>, vector<1x1x8xf32>
    %48 = vector.shape_cast %47 : vector<1x1x8xf32> to vector<1x8xf32>
    %49 = vector.shape_cast %46 : vector<1x8xf32> to vector<1x1x8xf32>
    tpu.vector_store %arg9[%c0_32, %c0_33, %c0_34], %49 {strides = array<i32>} : memref<1x1x8xf32, #tpu.memory_space<vmem>>, vector<1x1x8xf32>,
    return
  }
  func.func @transform_0(%arg0: i32, %arg1: i32) -> (i32, i32, i32, i32) {
    %c0_i32 = arith.constant 0 : i32
    %c0_i32_0 = arith.constant 0 : i32
    %c0_i32_1 = arith.constant 0 : i32
    return %arg0, %arg1, %c0_i32, %c0_i32_0 : i32, i32, i32, i32
  }
  func.func @transform_1(%arg0: i32, %arg1: i32) -> (i32, i32, i32, i32) {
    %c8_i32 = arith.constant 8 : i32
    %0 = arith.muli %arg1, %c8_i32 : i32
    %c1_i32 = arith.constant 1 : i32
    %1 = arith.subi %0, %c1_i32 : i32
    %c0_i32 = arith.constant 0 : i32
    %2 = arith.maxsi %1, %c0_i32 : i32
    %c0_i32_0 = arith.constant 0 : i32
    %c0_i32_1 = arith.constant 0 : i32
    %c0_i32_2 = arith.constant 0 : i32
    return %arg0, %2, %c0_i32_0, %c0_i32_1 : i32, i32, i32, i32
  }
  func.func @transform_2(%arg0: i32, %arg1: i32) -> (i32, i32, i32, i32) {
    %c8_i32 = arith.constant 8 : i32
    %0 = arith.muli %arg1, %c8_i32 : i32
    %c8_i32_0 = arith.constant 8 : i32
    %1 = arith.addi %0, %c8_i32_0 : i32
    %c15_i32 = arith.constant 15 : i32
    %2 = arith.minsi %1, %c15_i32 : i32
    %c0_i32 = arith.constant 0 : i32
    %c0_i32_1 = arith.constant 0 : i32
    %c0_i32_2 = arith.constant 0 : i32
    return %arg0, %2, %c0_i32, %c0_i32_1 : i32, i32, i32, i32
  }
  func.func @transform_3(%arg0: i32, %arg1: i32) -> (i32, i32, i32) {
    %c0_i32 = arith.constant 0 : i32
    %c0_i32_0 = arith.constant 0 : i32
    %c0_i32_1 = arith.constant 0 : i32
    %c0_i32_2 = arith.constant 0 : i32
    return %c0_i32, %c0_i32_0, %c0_i32_1 : i32, i32, i32
  }
  func.func @transform_4(%arg0: i32, %arg1: i32) -> (i32, i32) {
    %c0_i32 = arith.constant 0 : i32
    %c0_i32_0 = arith.constant 0 : i32
    %c0_i32_1 = arith.constant 0 : i32
    return %c0_i32, %c0_i32_0 : i32, i32
  }
  func.func @transform_5(%arg0: i32, %arg1: i32) -> (i32, i32, i32, i32) {
    %c0_i32 = arith.constant 0 : i32
    %c0_i32_0 = arith.constant 0 : i32
    %c0_i32_1 = arith.constant 0 : i32
    return %arg0, %arg1, %c0_i32, %c0_i32_0 : i32, i32, i32, i32
  }
  func.func @transform_6(%arg0: i32, %arg1: i32) -> (i32, i32, i32) {
    %c2_i32 = arith.constant 2 : i32
    %0 = arith.muli %arg0, %c2_i32 : i32
    %1 = arith.addi %0, %arg1 : i32
    %c0_i32 = arith.constant 0 : i32
    %c0_i32_0 = arith.constant 0 : i32
    %c0_i32_1 = arith.constant 0 : i32
    return %1, %c0_i32, %c0_i32_0 : i32, i32, i32
  }
  func.func @transform_7(%arg0: i32, %arg1: i32) -> (i32, i32, i32) {
    %c2_i32 = arith.constant 2 : i32
    %0 = arith.muli %arg0, %c2_i32 : i32
    %1 = arith.addi %0, %arg1 : i32
    %c0_i32 = arith.constant 0 : i32
    %c0_i32_0 = arith.constant 0 : i32
    %c0_i32_1 = arith.constant 0 : i32
    return %1, %c0_i32, %c0_i32_0 : i32, i32, i32
  }
}

</mosaic_0001>

<bundles_post_ra>
// kernel: tpu_custom_call.1
= control target key start
LH: loop header
LB: loop body
LE: loop exit
PB: predicated region body
PF: predicated region fallthrough
CT: control target
= control target key end

     0   :  { %s3497_s0 = inlined_call_operand.hbm [shape: bf16[2,16,18,4], index: 0, kind: input, shape index: {}]   ;;  %s3498_s1 = inlined_call_operand.hbm [shape: bf16[2,16,18,4], index: 1, kind: input, shape index: {}]   ;;  %s3499_s2 = inlined_call_operand.hbm [shape: bf16[2,16,18,4], index: 2, kind: input, shape index: {}]   ;;  %s3500_s3 = inlined_call_operand.hbm [shape: bf16[3,12,8], index: 3, kind: input, shape index: {}]   ;;  %s3501_s4 = inlined_call_operand.hbm [shape: f32[1,8], index: 4, kind: input, shape index: {}]   ;;  %s3502_s5 = inlined_call_operand.hbm [shape: bf16[2,16,16,8], index: 5, kind: output, shape index: {0}]   ;;  %s3503_s6 = inlined_call_operand.hbm [shape: f32[4,1,8], index: 6, kind: output, shape index: {1}]   ;;  %s3504_s7 = inlined_call_operand.hbm [shape: f32[4,1,8], index: 7, kind: output, shape index: {2}]  }
   0x1   :  { %3546 = sst [smem:[#allocation41_spill]] %s3497_s0 }
   0x2   :  { %3547 = sst [smem:[#allocation42_spill]] %s3498_s1 }
   0x3   :  { %3548 = sst [smem:[#allocation43_spill]] %s3499_s2 }
   0x4   :  { %3549 = sst [smem:[#allocation44_spill]] %s3500_s3 }
   0x5   :  { %3550 = sst [smem:[#allocation45_spill]] %s3501_s4 }
   0x6   :  { %3551 = sst [smem:[#allocation46_spill]] %s3502_s5 }
   0x7   :  { %3552 = sst [smem:[#allocation47_spill]] %s3503_s6 }
   0x8   :  { %3553 = sst [smem:[#allocation48_spill]] %s3504_s7 }
   0x9   :  { %13 = vsyncpa [#allocation3], 0 }
   0xa   :  { %15 = vsyncpa [#allocation3 + $0x1], 0 }
   0xb   :  { %16 = vsyncpa [#allocation6], 0 }
   0xc   :  { %18 = vsyncpa [#allocation6 + $0x1], 0 }
   0xd   :  { %19 = vsyncpa [#allocation9], 0 }
   0xe   :  { %20 = vsyncpa [#allocation4], 0 }
   0xf   :  { %22 = vsyncpa [#allocation4 + $0x1], 0 }
  0x10   :  { %23 = vsyncpa [#allocation13], 0 }
  0x11   :  { %25 = vsyncpa [#allocation13 + $0x1], 0  ;;  %s2586_s24 = smov 0   ;;  %s2588_s25 = smov 0  }
  0x12   :  { %s2590_s26 = smov 0   ;;  %s2592_s27 = smov 0  }
  0x13   :  { %s2594_s28 = smov 0   ;;  %s2596_s29 = smov 0  }
  0x14   :  { %s2598_s30 = smov 0   ;;  %s2600_s8 = smov 0  }
  0x15   :  { %s2602_s9 = smov 0   ;;  %s2604_s10 = smov 0  }
  0x16   :  { %s2606_s11 = smov 0   ;;  %s2608_s12 = smov 0  }
  0x17   :  { %s2610_s13 = smov 0   ;;  %s2612_s14 = smov 0  }
  0x18   :  { %s2614_s15 = smov 0   ;;  %s2616_s16 = smov 0  }
  0x19   :  { %s2618_s17 = smov 0  }
  0x1a LB: > { %3554 = sst [smem:[#allocation21_spill]] %s2467_s24  ;;  %s2672_s18 = sadd.s32 4294967295, %s2531_s17   ;;  %s2531_s17 = sphi %s2618_s17, %s31_s17   ;;  %s2527_s16 = sphi %s2616_s16, %s3652_s16   ;;  %s2523_s15 = sphi %s2614_s15, %s3651_s15   ;;  %s2519_s14 = sphi %s2612_s14, %s3650_s14   ;;  %s2515_s13 = sphi %s2610_s13, %s3661_s13   ;;  %s2511_s12 = sphi %s2608_s12, %s3660_s12   ;;  %s2507_s11 = sphi %s2606_s11, %s3659_s11   ;;  %s2503_s10 = sphi %s2604_s10, %s3658_s10   ;;  %s2499_s9 = sphi %s2602_s9, %s3657_s9   ;;  %s2495_s8 = sphi %s2600_s8, %s3656_s8   ;;  %s2491_s30 = sphi %s2598_s30, %s3645_s30   ;;  %s2487_s29 = sphi %s2596_s29, %s3655_s29   ;;  %s2483_s28 = sphi %s2594_s28, %s3644_s28   ;;  %s2479_s27 = sphi %s2592_s27, %s3643_s27   ;;  %s2475_s26 = sphi %s2590_s26, %s3654_s26   ;;  %s2471_s25 = sphi %s2588_s25, %s3653_s25   ;;  %s2467_s24 = sphi %s2586_s24, %s3642_s24  }
  0x1b   : > { %3555 = sst [smem:[#allocation22_spill]] %s2471_s25  ;;  %p3513_p0 = scmp.eq.s32.totalorder %s2672_s18, 0 }
  0x1c   : > { %3556 = sst [smem:[#allocation23_spill]] %s2479_s27  ;;  %p3512_p1 = scmp.eq.s32.totalorder %s2672_s18, 3 }
  0x1d   : > { %3557 = sst [smem:[#allocation24_spill]] %s2483_s28  ;;  %p234_p2 = scmp.ne.s32.totalorder %s2475_s26, %s2471_s25 }
  0x1e   : > { %3558 = sst [smem:[#allocation25_spill]] %s2487_s29  ;;  %p1689_p4 = scmp.ge.s32.totalorder %s2531_s17, 1 }
  0x1f   : > { %3559 = sst [smem:[#allocation26_spill]] %s2495_s8  ;;  %p278_p5 = scmp.lt.s32.totalorder %s2531_s17, 5 }
  0x20   : > { %3560 = sst [smem:[#allocation27_spill]] %s2511_s12  ;;  %p2685_p6 = por %p234_p2, %p3512_p1 }
  0x21   : > { %3561 = sst [smem:[#allocation28_spill]] %s2515_s13  ;;  %p2689_p7 = pnand %p1689_p4, %p278_p5 }
  0x22   : > { %3562 = sst [smem:[#allocation29_spill]] %s2519_s14  ;;  %s2533_s22 = smov [#allocation8]  }
  0x23   : > { %3563 = sst [smem:[#allocation30_spill]] %s2523_s15  ;;  %s290_s23 = sshll.u32 %s2533_s22, 4  ;;  %s291_s23 = int_to_ptr.vmem [resolvable:$true] %s290_s23 }
  0x24   : > { %3564 = sst [smem:[#allocation31_spill]] %s2527_s16  ;;  %p1948_p8 = pneg %p2689_p7 }
  0x25   : > { %s3565_s20 = scalar_select %p2685_p6, 1, 0 }
  0x26   : > { %s3567_s21 = scalar_select %p2689_p7, 1, 0 }
  0x27   : > { %3566 = sst [smem:[#allocation32_spill]] %s3565_s20  ;;  %p2697_p9 = pnand %p1948_p8, %p3513_p0 }
  0x28   : > { %3568 = sst [smem:[#allocation33_spill]] %s3567_s21  ;;  %s3570_s3 = sld [smem:[#allocation44_spill]] }
  0x29   : > { %p3538_p11 = pneg %p2697_p9 }
  0x2e   : > { %s2143_s20 = scalar_lea.hbm %s3570_s3, 384 }
  0x2f   : > { %p2144_p10 = scmp.ne.s32.totalorder %s3570_s3, %s2143_s20  ;;  %p2150_p2 = scmp.lt.u32.totalorder %s2143_s20, %s3570_s3 }
  0x31   : > { %p2146_p12 = pnand %p3538_p11, %p2144_p10 }
  0x33   : > { %p2147_p13 = pneg %p2146_p12 }
  0x35   : > { %p2152_p4 = pnand %p2150_p2, %p2147_p13 }
  0x37   : > { %2155 = shalt.err (!%p2152_p4)
}
  0x38   : > { %s2156_s6 = scalar_lea.vmem %s291_s23, 384  ;;  %p2164_p1 = scmp.lt.s32.totalorder %s291_s23, %s291_s23 }
  0x39   : > { %p2157_p5 = scmp.ne.s32.totalorder %s291_s23, %s2156_s6  ;;  %p2165_p0 = scmp.lt.s32.totalorder %s2156_s6, %s2156_s6 }
  0x3b   : > { %p2159_p8 = pnand %p2157_p5, %p3538_p11  ;;  %p2166_p6 = por %p2165_p0, %p2164_p1 }
  0x3d   : > { %p2160_p3 = pneg %p2159_p8 }
  0x3f   : > { %p2167_p7 = pnand %p2166_p6, %p2160_p3 }
  0x41   : > { %2170 = shalt.err (!%p2167_p7)
}
  0x42   : > { %s3518_s5 = smov 64   ;;  %s3520_s7 = smov 4  }
  0x43   : > { %1951 = dma.hbm_to_vmem [thread:$0]  (!%p2697_p9), %s3570_s3, 384, %s291_s23, [#allocation9], %s3518_s5, %s3518_s5, %s3520_s7  }
  0x44   : > { %s40_s20 = sadd.s32 1, %s2523_s15  ;;  %s43_s22 = sadd.s32 1, %s2527_s16 }
  0x45   : > { %p41_p0 = scmp.ge.s32.totalorder %s40_s20, 2  ;;  %p3537_p1 = scmp.eq.s32.totalorder %s2531_s17, 0 }
  0x46   : > { %s1679_s6 = sshll.u32 %s2523_s15, 3  ;;  %s88_s21 = sadd.s32 1, %s2499_s9 }
  0x47   : > { %s3663_s20 = smov (%p41_p0, %s40_s20), 0  ;;  %s3665_s22 = smov (!%p41_p0, %s43_s22), %s2527_s16 }
  0x48   : > { %3571 = sst [smem:[#allocation34_spill]] %s3663_s20  ;;  %s48_s2 = ssub.s32 %s2523_s15, %s3663_s20 }
  0x49   : > { %s1680_s27 = sadd.s32 4294967295, %s1679_s6  ;;  %p45_p3 = scmp.ge.s32.totalorder %s3665_s22, 2 }
  0x4a   : > { %p77_p6 = scmp.gt.s32.totalorder %s1680_s27, 0  ;;  %s1681_s23 = sshll.u32 %s3663_s20, 3 }
  0x4b   : > { %p95_p7 = scmp.ne.s32.totalorder %s2499_s9, %s2495_s8  ;;  %s3667_s22 = smov (%p45_p3, %s3665_s22), 0 }
  0x4c   : > { %3572 = sst [smem:[#allocation35_spill]] %s3667_s22  ;;  %s3669_s27 = smov (!%p77_p6, %s1680_s27), 0 }
  0x4d   : > { %s2745_s13 = ssub.s32 %s2527_s16, %s3667_s22  ;;  %s1682_s14 = sadd.s32 4294967295, %s1681_s23 }
  0x4e   : > { %3573 = sst [smem:[#allocation36_spill]] %s2745_s13  ;;  %s2748_s5 = sor.u32 %s48_s2, %s2745_s13 }
  0x4f   : > { %p81_p10 = scmp.gt.s32.totalorder %s1682_s14, 0  ;;  %p2753_p13 = por %p95_p7, %p3537_p1 }
  0x50   : > { %p101_p2 = scmp.ne.s32.totalorder %s2495_s8, %s2491_s30  ;;  %s2759_s3 = sadd.s32 8, %s1679_s6 }
  0x51   : > { %s3671_s14 = smov (!%p81_p10, %s1682_s14), 0  ;;  %3575 = sst [smem:[#allocation37_spill]] %s2759_s3 }
  0x52   : > { %s84_s2 = ssub.s32 %s3669_s27, %s3671_s14  ;;  %p3576_p5 = scmp.eq.s32.totalorder %s2672_s18, 0 }
  0x53   : > { %s85_s28 = sor.u32 %s84_s2, %s2745_s13  ;;  %s2770_s30 = sadd.s32 8, %s1681_s23 }
  0x54   : > { %p2766_p8 = por %p101_p2, %p3576_p5  ;;  %p86_p0 = scmp.eq.s32.totalorder %s85_s28, 0 }
  0x55   : > { %s1685_s6 = sshll.u32 %s2527_s16, 1  ;;  %s1686_s2 = sshll.u32 %s3667_s22, 1 }
  0x56   : > { %s3577_s29 = scalar_select %p2766_p8, 1, 0 }
  0x57   : > { %s2775_s14 = scalar_select %p86_p0, %s2499_s9, %s88_s21  }
  0x58   : > { %3578 = sst [smem:[#allocation38_spill]] %s3577_s29  ;;  %s218_s8 = sadd.s32 %s2523_s15, %s1685_s6 }
  0x59   : > { %3579 = sst [smem:[#allocation39_spill]] %s2775_s14  ;;  %s220_s13 = sadd.s32 %s1686_s2, %s3663_s20 }
  0x5a   : > { %p3536_p6 = scmp.lt.s32.totalorder %s2531_s17, 4  ;;  %s221_s3 = ssub.s32 %s218_s8, %s220_s13 }
  0x5b   : > { %s2782_s0 = smul.u32 48, %s2527_s16  ;;  %p222_p7 = scmp.eq.s32.totalorder %s221_s3, 0 }
  0x5c   : > { %s339_s28 = sand.u32 1, %s2531_s17   ;;  %s341_s29 = sand.u32 1, %s2499_s9  }
  0x5d   : > { %s3580_s24 = sadd.s32 1, %s2475_s26  ;;  %s1919_s25 = smul.u32 12, %s341_s29 }
  0x5e   : > { %s2789_s23 = scalar_select %p222_p7, %s2475_s26, %s3580_s24  }
  0x5f   : > { %p2795_p10 = pnand %p3536_p6, %p2753_p13  ;;  %s1920_s6 = smul.u32 3, %s3669_s27 }
  0x60   : > { %s343_s13 = scalar_lea.vmem [#allocation5], %s1919_s25  ;;  %s3582_s1 = sld [smem:[#allocation42_spill]] }
  0x61   : > { %s353_s8 = sadd.s32 %s1920_s6, %s2782_s0  ;;  %s356_s2 = sshll.u32 %s343_s13, 4  ;;  %s2801_s2 = int_to_ptr.vmem [resolvable:$true] %s356_s2 }
  0x62   : > { %s1698_s22 = sshll.u32 %s353_s8, 6  ;;  %s2536_s29 = smov [#allocation10]  }
  0x63   : > { %s2808_s7 = sshll.u32 %s2536_s29, 4  ;;  %s2810_s16 = scalar_lea.sflag [#allocation6], %s339_s28  ;;  %s305_s7 = int_to_ptr.vmem [resolvable:$true] %s2808_s7 }
  0x64   : > { %p2173_p2 = pneg %p2795_p10 }
  0x66   : > { %s2806_s24 = scalar_lea.hbm %s3582_s1, %s1698_s22  ;;  %s2176_s22 = scalar_lea.hbm %s3582_s1, 6144 }
  0x67   : > { %s2171_s27 = scalar_lea.hbm %s2806_s24, 192  ;;  %p2177_p7 = scmp.lt.u32.totalorder %s2806_s24, %s3582_s1 }
  0x68   : > { %p2172_p13 = scmp.ne.s32.totalorder %s2806_s24, %s2171_s27  ;;  %p2178_p3 = scmp.lt.u32.totalorder %s2176_s22, %s2171_s27 }
  0x69   : > { %p2180_p6 = scmp.lt.u32.totalorder %s2171_s27, %s2806_s24 }
  0x6a   : > { %p2174_p5 = pnand %p2173_p2, %p2172_p13  ;;  %p2179_p4 = por %p2178_p3, %p2177_p7 }
  0x6c   : > { %p2175_p0 = pneg %p2174_p5  ;;  %p2181_p1 = por %p2180_p6, %p2179_p4 }
  0x6e   : > { %p2182_p12 = pnand %p2181_p1, %p2175_p0 }
  0x70   : > { %2185 = shalt.err (!%p2182_p12)
}
  0x71   : > { %s2186_s28 = scalar_lea.vmem %s2801_s2, 192  ;;  %s2537_s13 = smov [#allocation5]  }
  0x72   : > { %p2187_p13 = scmp.ne.s32.totalorder %s2801_s2, %s2186_s28  ;;  %s2191_s3 = sshll.u32 %s2537_s13, 4  ;;  %s2192_s3 = int_to_ptr.vmem [resolvable:$false] %s2191_s3 }
  0x73   : > { %s2193_s29 = scalar_lea.vmem %s2192_s3, 384  ;;  %p2194_p8 = scmp.lt.s32.totalorder %s2801_s2, %s2192_s3 }
  0x74   : > { %p2189_p5 = pnand %p2187_p13, %p2173_p2  ;;  %p2195_p3 = scmp.lt.s32.totalorder %s2193_s29, %s2186_s28 }
  0x76   : > { %p2190_p11 = pneg %p2189_p5  ;;  %p2196_p7 = por %p2195_p3, %p2194_p8 }
  0x78   : > { %p2197_p4 = pnand %p2196_p7, %p2190_p11 }
  0x7a   : > { %2200 = shalt.err (!%p2197_p4)
}
  0x7b   : > { %s3583_s27 = smov 4   ;;  %s3584_s25 = smov 64  }
  0x7c   : > { %1961 = dma.hbm_to_vmem [thread:$0]  (!%p2795_p10), %s2806_s24, 192, %s2801_s2, %s2810_s16, %s3584_s25, %s3584_s25, %s3583_s27  }
  0x7d   : > { %s3585_s4 = sld [smem:[#allocation45_spill]]  ;;  %p3586_p1 = pneg %p2697_p9 }
  0x83   : > { %s2201_s6 = scalar_lea.hbm %s3585_s4, 16 }
  0x84   : > { %p2202_p11 = scmp.ne.s32.totalorder %s3585_s4, %s2201_s6  ;;  %p2208_p6 = scmp.lt.u32.totalorder %s2201_s6, %s3585_s4 }
  0x86   : > { %p2204_p12 = pnand %p2202_p11, %p3586_p1 }
  0x88   : > { %p2205_p8 = pneg %p2204_p12 }
  0x8a   : > { %p2210_p2 = pnand %p2208_p6, %p2205_p8 }
  0x8c   : > { %2213 = shalt.err (!%p2210_p2)
}
  0x8d   : > { %s2214_s2 = scalar_lea.vmem %s305_s7, 16  ;;  %p3587_p0 = pmov %p3586_p1 }
  0x8e   : > { %p2215_p10 = scmp.ne.s32.totalorder %s305_s7, %s2214_s2  ;;  %s2221_s24 = scalar_lea.vmem %s305_s7, 32 }
  0x8f   : > { %p2222_p3 = scmp.lt.s32.totalorder %s305_s7, %s305_s7  ;;  %p2223_p7 = scmp.lt.s32.totalorder %s2221_s24, %s2214_s2 }
  0x90   : > { %p2217_p13 = pnand %p2215_p10, %p3587_p0 }
  0x91   : > { %p2224_p4 = por %p2223_p7, %p2222_p3 }
  0x92   : > { %p2218_p5 = pneg %p2217_p13 }
  0x94   : > { %p2225_p1 = pnand %p2224_p4, %p2218_p5 }
  0x96   : > { %2228 = shalt.err (!%p2225_p1)
}
  0x97   : > { %s3588_s20 = sld [smem:[#allocation22_spill]]  ;;  %s3589_s22 = sld [smem:[#allocation21_spill]] }
  0x98   : > { %1954 = dma.hbm_to_vmem [thread:$0]  (!%p2697_p9), %s3585_s4, 16, %s305_s7, [#allocation9]  }
  0x99   : > { %s3540_s19 = sadd.s32 4294967294, %s2531_s17   ;;  %s52_s6 = sadd.s32 1, %s2511_s12 }
  0x9a   : > { %p59_p11 = scmp.ne.s32.totalorder %s2511_s12, %s2507_s11  ;;  %p3590_p12 = scmp.eq.s32.totalorder %s2748_s5, 0 }
  0x9b   : > { %p3592_p8 = scmp.eq.s32.totalorder %s2531_s17, 0  ;;  %p65_p2 = scmp.ne.s32.totalorder %s2507_s11, %s2503_s10 }
  0x9c   : > { %s2869_s8 = scalar_select %p3590_p12, %s2511_s12, %s52_s6  }
  0x9d   : > { %p61_p6 = por %p3592_p8, %p59_p11  ;;  %p3593_p10 = scmp.eq.s32.totalorder %s2672_s18, 3 }
  0x9e   : > { %3591 = sst [smem:[#allocation40_spill]] %s2869_s8  ;;  %p211_p13 = scmp.eq.s32.totalorder %s3540_s19, 3 }
  0x9f   : > { %p2877_p0 = por %p3593_p10, %p59_p11  ;;  %p3595_p5 = scmp.eq.s32.totalorder %s2672_s18, 0 }
  0xa0   : > { %s315_s21 = sand.u32 1, %s2511_s12   ;;  %p2890_p9 = por %p211_p13, %p65_p2 }
  0xa1   : > { %s3594_s28 = scalar_select %p2877_p0, 1, 0 }
  0xa2   : > { %p2885_p3 = por %p3595_p5, %p65_p2  ;;  %p3598_p7 = scmp.ne.s32.totalorder %s3588_s20, %s3589_s22 }
  0xa3   : > { %s3597_s5 = scalar_select %p2890_p9, 1, 0 }
  0xa4   : > { %p2897_p4 = por %p3598_p7, %p211_p13  ;;  %s1916_s2 = smul.u32 96, %s315_s21 }
  0xa5   : > { %s1917_s24 = smul.u32 24, %s2523_s15  ;;  %p3600_p1 = scmp.lt.s32.totalorder %s2531_s17, 4 }
  0xa6   : > { %s3599_s13 = scalar_select %p2897_p4, 1, 0 }
  0xa7   : > { %p2904_p11 = pnand %p3600_p1, %p61_p6  ;;  %s326_s29 = sadd.s32 %s2782_s0, %s1917_s24 }
  0xa8   : > { %s319_s6 = scalar_lea.vmem [#allocation2], %s1916_s2  ;;  %s1695_s1 = sshll.u32 %s326_s29, 6 }
  0xa9   : > { %s329_s19 = sshll.u32 %s319_s6, 4  ;;  %s3602_s4 = sld [smem:[#allocation41_spill]]  ;;  %s2909_s19 = int_to_ptr.vmem [resolvable:$true] %s329_s19 }
  0xaa   : > { %s2916_s15 = scalar_lea.sflag [#allocation3], %s315_s21  ;;  %p2231_p8 = pneg %p2904_p11 }
  0xaf   : > { %s2914_s8 = scalar_lea.hbm %s3602_s4, %s1695_s1  ;;  %s2234_s29 = scalar_lea.hbm %s3602_s4, 6144 }
  0xb0   : > { %s2229_s12 = scalar_lea.hbm %s2914_s8, 1536  ;;  %p2235_p10 = scmp.lt.u32.totalorder %s2914_s8, %s3602_s4 }
  0xb1   : > { %p2230_p12 = scmp.ne.s32.totalorder %s2914_s8, %s2229_s12  ;;  %p2236_p13 = scmp.lt.u32.totalorder %s2234_s29, %s2229_s12 }
  0xb2   : > { %p2238_p7 = scmp.lt.u32.totalorder %s2229_s12, %s2914_s8 }
  0xb3   : > { %p2232_p6 = pnand %p2231_p8, %p2230_p12  ;;  %p2237_p5 = por %p2236_p13, %p2235_p10 }
  0xb5   : > { %p2233_p2 = pneg %p2232_p6  ;;  %p2239_p1 = por %p2238_p7, %p2237_p5 }
  0xb7   : > { %p2240_p4 = pnand %p2239_p1, %p2233_p2 }
  0xb9   : > { %2243 = shalt.err (!%p2240_p4)
}
  0xba   : > { %s2244_s21 = scalar_lea.vmem %s2909_s19, 1536  ;;  %s2538_s20 = smov [#allocation2]  }
  0xbb   : > { %p2245_p12 = scmp.ne.s32.totalorder %s2909_s19, %s2244_s21  ;;  %s2249_s22 = sshll.u32 %s2538_s20, 4  ;;  %s2250_s22 = int_to_ptr.vmem [resolvable:$false] %s2249_s22 }
  0xbc   : > { %s2251_s2 = scalar_lea.vmem %s2250_s22, 3072  ;;  %p2252_p0 = scmp.lt.s32.totalorder %s2909_s19, %s2250_s22 }
  0xbd   : > { %p2247_p6 = pnand %p2245_p12, %p2231_p8  ;;  %p2253_p10 = scmp.lt.s32.totalorder %s2251_s2, %s2244_s21 }
  0xbf   : > { %p2248_p9 = pneg %p2247_p6  ;;  %p2254_p13 = por %p2253_p10, %p2252_p0 }
  0xc1   : > { %p2255_p5 = pnand %p2254_p13, %p2248_p9 }
  0xc3   : > { %2258 = shalt.err (!%p2255_p5)
}
  0xc4   : > { %s3603_s12 = sld [smem:[#allocation25_spill]]  ;;  %s3605_s29 = sld [smem:[#allocation24_spill]] }
  0xc5   : > { %s3604_s24 = sld [smem:[#allocation37_spill]]  ;;  %s3606_s1 = sld [smem:[#allocation23_spill]] }
  0xc6   : > { %s3607_s6 = sld [smem:[#allocation36_spill]]  ;;  %p3609_p9 = scmp.lt.s32.totalorder %s2770_s30, 15 }
  0xc7   : > { %1958 = dma.hbm_to_vmem [thread:$0]  (!%p2904_p11), %s2914_s8, 1536, %s2909_s19, %s2916_s15, %s3584_s25, %s3584_s25, %s3583_s27  }
  0xc8   : > { %s3675_s30 = smov (!%p3609_p9, %s2770_s30), 15  ;;  %p3610_p2 = scmp.eq.s32.totalorder %s2531_s17, 0 }
  0xc9   : > { %p3611_p12 = scmp.eq.s32.totalorder %s2672_s18, 0  ;;  %p3613_p11 = scmp.lt.s32.totalorder %s2531_s17, 4 }
  0xca   : > { %s124_s3 = sadd.s32 1, %s3603_s12  ;;  %p131_p4 = scmp.ne.s32.totalorder %s3603_s12, %s3605_s29 }
  0xcb   : > { %p3608_p0 = scmp.lt.s32.totalorder %s3604_s24, 15  ;;  %p137_p8 = scmp.ne.s32.totalorder %s3605_s29, %s3606_s1 }
  0xcc   : > { %s368_s20 = sand.u32 1, %s3603_s12   ;;  %p133_p7 = por %p131_p4, %p3610_p2 }
  0xcd   : > { %s3673_s24 = smov (!%p3608_p0, %s3604_s24), 15  ;;  %p2964_p6 = por %p137_p8, %p3611_p12 }
  0xce   : > { %s120_s21 = ssub.s32 %s3673_s24, %s3675_s30  ;;  %s1922_s15 = smul.u32 12, %s368_s20 }
  0xcf   : > { %s121_s22 = sor.u32 %s120_s21, %s3607_s6  ;;  %p2970_p10 = pnand %p3613_p11, %p133_p7 }
  0xd0   : > { %p122_p1 = scmp.eq.s32.totalorder %s121_s22, 0  ;;  %s1923_s30 = smul.u32 3, %s3673_s24 }
  0xd1   : > { %s3612_s2 = scalar_select %p2964_p6, 1, 0 }
  0xd2   : > { %s3677_s12 = smov (!%p122_p1, %s3603_s12), %s124_s3  ;;  %s370_s8 = scalar_lea.vmem [#allocation7], %s1922_s15 }
  0xd3   : > { %s383_s29 = sshll.u32 %s370_s8, 4  ;;  %s380_s1 = sadd.s32 %s1923_s30, %s2782_s0  ;;  %s2978_s29 = int_to_ptr.vmem [resolvable:$true] %s383_s29 }
  0xd4   : > { %s1700_s6 = sshll.u32 %s380_s1, 6  ;;  %s3615_s4 = sld [smem:[#allocation43_spill]] }
  0xd5   : > { %p2261_p5 = pneg %p2970_p10 }
  0xda   : > { %s2983_s20 = scalar_lea.hbm %s3615_s4, %s1700_s6  ;;  %s2264_s3 = scalar_lea.hbm %s3615_s4, 6144 }
  0xdb   : > { %s2259_s14 = scalar_lea.hbm %s2983_s20, 192  ;;  %p2265_p4 = scmp.lt.u32.totalorder %s2983_s20, %s3615_s4 }
  0xdc   : > { %p2260_p13 = scmp.ne.s32.totalorder %s2983_s20, %s2259_s14  ;;  %p2266_p8 = scmp.lt.u32.totalorder %s2264_s3, %s2259_s14 }
  0xdd   : > { %p2268_p7 = scmp.lt.u32.totalorder %s2259_s14, %s2983_s20 }
  0xde   : > { %p2262_p0 = pnand %p2261_p5, %p2260_p13  ;;  %p2267_p2 = por %p2266_p8, %p2265_p4 }
  0xe0   : > { %p2263_p9 = pneg %p2262_p0  ;;  %p2269_p1 = por %p2268_p7, %p2267_p2 }
  0xe2   : > { %p2270_p12 = pnand %p2269_p1, %p2263_p9 }
  0xe4   : > { %2273 = shalt.err (!%p2270_p12)
}
  0xe5   : > { %s2274_s8 = scalar_lea.vmem %s2978_s29, 192  ;;  %s2539_s1 = smov [#allocation7]  }
  0xe6   : > { %p2275_p11 = scmp.ne.s32.totalorder %s2978_s29, %s2274_s8  ;;  %s2279_s6 = sshll.u32 %s2539_s1, 4  ;;  %s2280_s6 = int_to_ptr.vmem [resolvable:$false] %s2279_s6 }
  0xe7   : > { %s2281_s21 = scalar_lea.vmem %s2280_s6, 384  ;;  %p2282_p6 = scmp.lt.s32.totalorder %s2978_s29, %s2280_s6 }
  0xe8   : > { %p2277_p13 = pnand %p2275_p11, %p2261_p5  ;;  %p2283_p4 = scmp.lt.s32.totalorder %s2281_s21, %s2274_s8 }
  0xea   : > { %p2278_p0 = pneg %p2277_p13  ;;  %p2284_p8 = por %p2283_p4, %p2282_p6 }
  0xec   : > { %p2285_p2 = pnand %p2284_p8, %p2278_p0 }
  0xee   : > { %2288 = shalt.err (!%p2285_p2)
}
  0xef   : > { %1964 = dma.hbm_to_vmem [thread:$0]  (!%p2970_p10), %s2983_s20, 192, %s2978_s29, %s2810_s16, %s3584_s25, %s3584_s25, %s3583_s27  }
  0xf0   : > { %s3616_s14 = sld [smem:[#allocation33_spill]] }
  0xf6   : > { %p3617_p5 = scmp.ne.s32.totalorder %s3616_s14, 0 }
  0xf7   : > { %s3017_s22 = sand.u32 (!%p3617_p5), 1, %s2507_s11  }
  0xf8   : > { %395 = sbr.rel (%p3617_p5) target bundleno = 755 (0x2f3), region = 40  ;;  %s398_s24 = scalar_lea.sflag (!%p3617_p5), [#allocation3], %s3017_s22 }
  0xf9   : > { %s1925_s0 = smul.u32 (!%p3617_p5), 96, %s3017_s22 }
  0xfb   : > { %s3021_s3 = scalar_lea.vmem (!%p3617_p5), [#allocation2], %s1925_s0 }
  0xff   : > { %2442 = dma.done.wait (%p2885_p3), %s398_s24, 1536  }
 0x100   : > { %2444 = vsyncadd (%p2885_p3), %s398_s24, 4294965760  ;;  %s3618_s16 = sld [smem:[#allocation26_spill]]  ;;  %s406_s25 = sand.u32 1, %s2672_s18  }
 0x101   : > { %s3619_s27 = sld [smem:[#allocation38_spill]]  ;;  %s407_s20 = scalar_lea.sflag [#allocation6], %s406_s25 }
 0x106   : > { %s408_s19 = sand.u32 1, %s3618_s16  }
 0x107   : > { %s1926_s29 = smul.u32 12, %s408_s19  ;;  %p3620_p6 = scmp.ne.s32.totalorder %s3619_s27, 0 }
 0x109   : > { %s410_s15 = scalar_lea.vmem [#allocation5], %s1926_s29 }
 0x10a   : > { %2446 = dma.done.wait (%p3620_p6), %s407_s20, 192  }
 0x10b   : > { %2448 = vsyncadd (%p3620_p6), %s407_s20, 4294967104  ;;  %s3621_s30 = sld [smem:[#allocation24_spill]]  ;;  %p3622_p3 = scmp.ne.s32.totalorder %s3612_s2, 0 }
 0x111   : > { %s417_s8 = sand.u32 1, %s3621_s30  }
 0x112   : > { %s1927_s7 = smul.u32 12, %s417_s8 }
 0x114   : > { %s3036_s1 = scalar_lea.vmem [#allocation7], %s1927_s7 }
 0x115   : > { %2450 = dma.done.wait (%p3622_p3), %s407_s20, 192  }
 0x116   : > { %2452 = vsyncadd (%p3622_p3), %s407_s20, 4294967104  ;;  %p3623_p10 = scmp.eq.s32.totalorder %s2672_s18, 0 }
 0x118   : > { %2454 = dma.done.wait (%p3623_p10), [#allocation9], 400   ;;  %p3624_p9 = pmov %p3623_p10 }
 0x119   : > { %s3625_s6 = sld [smem:[#allocation28_spill]]  ;;  %vm756_vm1 = vcmask 1046528   ;;  %vm615_vm2 = vsmask.f32 7424  ;;  %v516_v1 = vld [vmem:[%s410_s15] sm:$0xf] }
 0x11a   : > { %2456 = vsyncadd (%p3624_p9), [#allocation9], 4294966896  ;;  %v517_v2 = vld [vmem:[%s410_s15 + $0x4] sm:$0xf]  ;;  %v518_v3 = vld [vmem:[%s410_s15 + $0x8] sm:$0x1] }
 0x11b   : > { %v3049_v7 = vld [vmem:[%s3021_s3] sm:$0xff]   ;;  %v2125_v10 = vld [vmem:[%s3021_s3 + $0x8] ss:$0 sps:$4 sm:$0x11]   ;;  %v3057_v13 = vld [vmem:[%s3021_s3 + $0xc] sm:$0xff]   ;;  %s2540_s2 = smov 8  }
 0x11c   : > { %v629_v11 = vshrl.u32 %v3049_v7, 16  ;;  %v631_v12 = vshll.u32 %v3049_v7, 16  ;;  %v636_v17 = vshll.u32 %v2125_v10, 16  ;;  %v2127_v18 = vld [vmem:[%s3021_s3 + $0x14] ss:$0 sps:$4 sm:$0x11]  }
 0x11d   : > { %v641_v19 = vshrl.u32 %v3057_v13, 16  ;;  %v643_v21 = vshll.u32 %v3057_v13, 16  ;;  %v3067_v24 = vld [vmem:[%s3021_s3 + $0x24] sm:$0xff]   ;;  %v648_v27 = vshll.u32 %v2127_v18, 16  ;;  %v3071_v29 = vld [vmem:[%s3021_s3 + $0x18] sm:$0xff]   ;;  %v763_v32 = vrot.slane %v3057_v13, 1 }
 0x11e   : > { %v633_v16 = vrot.slane %v631_v12, 1  ;;  %v638_v26 = vrot.slane %v636_v17, 1  ;;  %v764_v33 = vrot.slane %v2127_v18, 1  ;;  %v760_v37 = vrot.slane %v3049_v7, 1  ;;  %s2541_s14 = smov 4   ;;  %v3079_v42 = vld [vmem:[%s3021_s3 + $0x3c] sm:$0xff]  }
 0x11f   : > { %p515_p7 = scmp.gt.s32.totalorder %s3625_s6, 0  ;;  %p525_p1 = scmp.lt.s32.totalorder %s3625_s6, 1  ;;  %v645_v30 = vrot.slane %v643_v21, 1  ;;  %v650_v35 = vrot.slane %v648_v27, 1  ;;  %v761_v41 = vrot.slane %v2125_v10, 1  ;;  %v665_v43 = vshrl.u32 %v3067_v24, 16 }
 0x120   : > { %v634_v25 = vor.u32 %v633_v16, %v629_v11  ;;  %v2129_v38 = vld [vmem:[%s3021_s3 + $0x2c] ss:$0 sps:$4 sm:$0x11]   ;;  %v667_v44 = vshll.u32 %v3067_v24, 16  ;;  %v653_v46 = vshrl.u32 %v3071_v29, 16  ;;  %v655_v50 = vshll.u32 %v3071_v29, 16 }
 0x121   : > { %s519_s21 = scalar_select %p515_p7, 1, 0  ;;  %v646_v39 = vor.u32 %v645_v30, %v641_v19  ;;  %v672_v45 = vshll.u32 %v2129_v38, 16  ;;  %v2131_v49 = vld [vmem:[%s3021_s3 + $0x20] ss:$0 sps:$4 sm:$0x11]   ;;  %v765_v52 = vsel %vm756_vm1, %v763_v32, %v764_v33  ;;  %v762_v56 = vsel %vm756_vm1, %v760_v37, %v761_v41 }
 0x122   : > { %v639_v34 = vsel %vm615_vm2, %v634_v25, %v638_v26  ;;  %v669_v51 = vrot.slane %v667_v44, 1  ;;  %s3091_s0 = scalar_select %p525_p1, 1, 0  ;;  %v657_v54 = vrot.slane %v655_v50, 1  ;;  %v660_v55 = vshll.u32 %v2131_v49, 16  ;;  %v3100_v61 = vld [vmem:[%s3021_s3 + $0x30] sm:$0xff]  }
 0x123   : > { %v520_v0 = vstv %s519_s21  ;;  %738 = vrot.lane.b32.xlu0 %v639_v34, %s2541_s14  ;;  %v651_v47 = vsel %vm615_vm2, %v646_v39, %v650_v35  ;;  %v674_v53 = vrot.slane %v672_v45, 1  ;;  %v769_v58 = vrot.slane %v3067_v24, 1  ;;  %v2133_v59 = vld [vmem:[%s3021_s3 + $0x44] ss:$0 sps:$4 sm:$0x11]   ;;  %v3116_v19 = vld [vmem:[%s3021_s3 + $0x48] sm:$0xff]  }
 0x124   : > { %vm521_vm0 = vcmp.eq.s32.totalorder %v520_v0, 1  ;;  %v670_v57 = vor.u32 %v669_v51, %v665_v43  ;;  %v691_v60 = vshll.u32 %v3079_v42, 16  ;;  %v658_v62 = vor.u32 %v657_v54, %v653_v46  ;;  %v2135_v10 = vld [vmem:[%s3021_s3 + $0x38] ss:$0 sps:$4 sm:$0x11]   ;;  %s1704_s24 = sshll.u32 %s3017_s22, 6 }
 0x125   : > { %v522_v4 = vsel %vm521_vm0, %v516_v1, 0  ;;  %v523_v5 = vsel %vm521_vm0, %v517_v2, 0  ;;  %v524_v6 = vsel %vm521_vm0, %v518_v3, 0  ;;  %v662_v63 = vrot.slane %v660_v55, 1  ;;  %v526_v37 = vld [vmem:[%s3036_s1] sm:$0xf] }
 0x126   : > { %v3051_v8 = vcombine.low %v522_v4, %v523_v5  ;;  %v1715_v9 = vcombine.low %v524_v6, %v524_v6  ;;  %v770_v0 = vrot.slane %v2129_v38, 1  ;;  %v689_v1 = vshrl.u32 %v3079_v42, 16  ;;  %v3105_v4 = vld [vmem:[%s3021_s3 + $0x54] sm:$0xff]   ;;  %v3120_v21 = vld [vmem:[%s3021_s3 + $0x5c] ss:$0 sps:$4 sm:$0x11]  }
 0x127   : > { %v693_v2 = vrot.slane %v691_v60, 1  ;;  %v696_v3 = vshll.u32 %v2133_v59, 16  ;;  %v675_v5 = vsel %vm615_vm2, %v670_v57, %v674_v53  ;;  %v766_v6 = vrot.slane %v3071_v29, 1  ;;  %v527_v43 = vld [vmem:[%s3036_s1 + $0x4] sm:$0xf]  ;;  %s3628_s16 = sld [smem:[#allocation29_spill]] }
 0x128   : > { %v757_v14 = vrot.slane %v3051_v8, 1  ;;  %v758_v15 = vrot.slane %v1715_v9, 1  ;;  %v617_v22 = vshrl.u32 %v3051_v8, 16  ;;  %v619_v23 = vshll.u32 %v3051_v8, 16  ;;  %v528_v46 = vld [vmem:[%s3036_s1 + $0x8] sm:$0x1] }
 0x129   : > { %v624_v28 = vshll.u32 %v1715_v9, 16  ;;  %v767_v9 = vrot.slane %v2131_v49, 1  ;;  %v679_v11 = vshll.u32 %v3100_v61, 16  ;;  %v663_v12 = vsel %vm615_vm2, %v658_v62, %v662_v63  ;;  %v2141_v55 = vld [vmem:[#allocation8] sm:$0x3f]   ;;  %s1796_s27 = sshll.u32 %s3625_s6, 4 }
 0x12a   : > { %v759_v20 = vsel %vm756_vm1, %v757_v14, %v758_v15  ;;  %v621_v31 = vrot.slane %v619_v23, 1  ;;  %v677_v14 = vshrl.u32 %v3100_v61, 16  ;;  %v530_v15 = vstv %s3091_s0  ;;  %s3629_s7 = sld [smem:[#allocation46_spill]]  ;;  %s1408_s21 = scalar_lea.sflag [#allocation4], %s3017_s22 }
 0x12b   : > { %787 = vrot.lane.b32.xlu1 %v759_v20, %s2540_s2  ;;  %v626_v36 = vrot.slane %v624_v28, 1  ;;  %v698_v16 = vrot.slane %v696_v3, 1  ;;  %v681_v17 = vrot.slane %v679_v11, 1  ;;  %v684_v18 = vshll.u32 %v2135_v10, 16  ;;  %p3630_p11 = scmp.ne.s32.totalorder %s3594_s28, 0  ;;  %s2542_s0 = smov [#allocation11]  }
 0x12c   : > { %v622_v40 = vor.u32 %v621_v31, %v617_v22  ;;  %v694_v20 = vor.u32 %v693_v2, %v689_v1  ;;  %v715_v22 = vshll.u32 %v3105_v4, 16  ;;  %v771_v23 = vsel %vm756_vm1, %v769_v58, %v770_v0  ;;  %v3132_v31 = vld [vmem:[%s3021_s3 + $0x50] ss:$0 sps:$4 sm:$0x11]   ;;  %v2142_v1 = vld [vmem:[#allocation8 + $0x10] sm:$0x3f]  }
 0x12d   : > { %v768_v25 = vsel %vm756_vm1, %v766_v6, %v767_v9  ;;  %vm3126_vm3 = vcmp.eq.s32.totalorder %v530_v15, 1  ;;  %v682_v27 = vor.u32 %v681_v17, %v677_v14  ;;  %v686_v28 = vrot.slane %v684_v18, 1  ;;  %s3248_s3 = scalar_lea.vmem [#allocation11], %s1704_s24  ;;  %s1772_s19 = sshll.u32 %s3628_s16, 5 }
 0x12e   : > { %v627_v48 = vsel %vm615_vm2, %v622_v40, %v626_v36  ;;  %v775_v30 = vrot.slane %v3079_v42, 1  ;;  %v703_v32 = vshll.u32 %v3116_v19, 16  ;;  %v776_v33 = vrot.slane %v2133_v59, 1  ;;  %s1429_s29 = sadd.s32 %s1796_s27, %s1772_s19  ;;  %s1432_s20 = sshll.u32 %s3248_s3, 4  ;;  %s3316_s20 = int_to_ptr.vmem [resolvable:$true] %s1432_s20 }
 0x12f   : > { %740 = vrot.lane.b32.xlu1 %v651_v47, %s2541_s14  ;;  %736 = vrot.lane.b32.xlu0 %v627_v48, %s2541_s14  ;;  %v772_v34 = vrot.slane %v3100_v61, 1  ;;  %v773_v35 = vrot.slane %v2135_v10, 1  ;;  %v713_v36 = vshrl.u32 %v3105_v4, 16  ;;  %v699_v38 = vsel %vm615_vm2, %v694_v20, %v698_v16  ;;  %s1773_s15 = sshll.u32 %s1429_s29, 6  ;;  %s2293_s24 = sshll.u32 %s2542_s0, 4  ;;  %s2294_s24 = int_to_ptr.vmem [resolvable:$false] %s2293_s24 }
 0x130   : > { %v717_v39 = vrot.slane %v715_v22, 1  ;;  %v720_v40 = vshll.u32 %v3120_v21, 16  ;;  %v701_v41 = vshrl.u32 %v3116_v19, 16  ;;  %v705_v44 = vrot.slane %v703_v32, 1  ;;  %s3324_s1 = scalar_lea.hbm %s3629_s7, %s1773_s15  ;;  %s2295_s27 = scalar_lea.vmem %s2294_s24, 2048 }
 0x131   : > { %v708_v45 = vshll.u32 %v3132_v31, 16  ;;  %v532_v47 = vsel %vm3126_vm3, %v526_v37, 0  ;;  %v533_v48 = vsel %vm3126_vm3, %v527_v43, 0  ;;  %v687_v49 = vsel %vm615_vm2, %v682_v27, %v686_v28  ;;  %p2296_p4 = scmp.lt.s32.totalorder %s3316_s20, %s2294_s24 }
 0x132   : > { %v534_v50 = vsel %vm3126_vm3, %v528_v46, 0  ;;  %v3153_v51 = vcombine.low %v532_v47, %v533_v48  ;;  %vm876_vm4 = vcmask 1045504   ;;  %v777_v53 = vsel %vm756_vm1, %v775_v30, %v776_v33 }
 0x133   : > { %791 = vrot.lane.b32.xlu1 %v765_v52, %s2540_s2  ;;  %789 = vrot.lane.b32.xlu0 %v762_v56, %s2540_s2  ;;  %v2140_v52 = vld [vmem:[#allocation8 + $0x8] sm:$0x3f]   ;;  %v774_v54 = vsel %vm756_vm1, %v772_v34, %v773_v35  ;;  %v718_v56 = vor.u32 %v717_v39, %v713_v36  ;;  %v722_v57 = vrot.slane %v720_v40, 1  ;;  %v706_v58 = vor.u32 %v705_v44, %v701_v41 }
 0x134   : > { %v710_v59 = vrot.slane %v708_v45, 1  ;;  %1912 = vmatprep.subr.msk.bf16.mxu1 %vm876_vm4, %v2140_v52  ;;  %v1724_v60 = vcombine.low %v534_v50, %v534_v50  ;;  %v727_v62 = vshll.u32 %v3153_v51, 16  ;;  %1913 = vmatprep.subr.msk.bf16.mxu0 %vm876_vm4, %v2141_v55  ;;  %v878_v63 = vsel %vm876_vm4, %v2140_v52, 0 }
 0x135   : > { %v985_v0 = vsel %vm876_vm4, %v2141_v55, 0  ;;  %1825 = vmatpush3.bf16.msra.mxu1 %v878_v63  ;;  %v781_v2 = vrot.slane %v3105_v4, 1  ;;  %v782_v3 = vrot.slane %v3120_v21, 1  ;;  %v778_v6 = vrot.slane %v3116_v19, 1 }
 0x136   : > { %1843 = vmatpush3.bf16.msra.mxu0 %v985_v0  ;;  %1914 = vmatprep.subr.msk.bf16.mxu1 %vm876_vm4, %v2141_v55  ;;  %v779_v9 = vrot.slane %v3132_v31, 1  ;;  %v1095_v10 = vsel %vm876_vm4, %v2142_v1, 0  ;;  %v711_v11 = vsel %vm615_vm2, %v706_v58, %v710_v59  ;;  %v729_v14 = vrot.slane %v727_v62, 1 }
 0x137   : > { %744 = vrot.lane.b32.xlu1 %v675_v5, %s2541_s14  ;;  %742 = vrot.lane.b32.xlu0 %v663_v12, %s2541_s14  ;;  %v723_v5 = vsel %vm615_vm2, %v718_v56, %v722_v57  ;;  %v725_v12 = vshrl.u32 %v3153_v51, 16  ;;  %v732_v15 = vshll.u32 %v1724_v60, 16  ;;  %v783_v16 = vsel %vm756_vm1, %v781_v2, %v782_v3 }
 0x138   : > { %1915 = vmatprep.subr.msk.bf16.mxu0 %vm876_vm4, %v2142_v1  ;;  %v784_v17 = vrot.slane %v3153_v51, 1  ;;  %v785_v18 = vrot.slane %v1724_v60, 1  ;;  %v780_v20 = vsel %vm756_vm1, %v778_v6, %v779_v9  ;;  %vm828_vm5 = vcmask 64512   ;;  %v3241_v9 = vld [vmem:[#allocation10] ss:$0 sm:$0xff] }
 0x139   : > { %v730_v21 = vor.u32 %v729_v14, %v725_v12  ;;  %v734_v22 = vrot.slane %v732_v15, 1  ;;  %vm807_vm6 = vcmask 31744   ;;  %vm859_vm7 = vcmask 97280  }
 0x13a   : > { %vm1297_vm8 = vcmask 60416  }
 0x13b   : > { %795 = vrot.lane.b32.xlu1 %v771_v23, %s2540_s2  ;;  %793 = vrot.lane.b32.xlu0 %v768_v25, %s2540_s2  ;;  %v786_v23 = vsel %vm756_vm1, %v784_v17, %v785_v18  ;;  %v735_v25 = vsel %vm615_vm2, %v730_v21, %v734_v22 }
 0x13f   : > { %748 = vrot.lane.b32.xlu1 %v699_v38, %s2541_s14  ;;  %746 = vrot.lane.b32.xlu0 %v687_v49, %s2541_s14 }
 0x143   : > { %799 = vrot.lane.b32.xlu1 %v777_v53, %s2540_s2  ;;  %797 = vrot.lane.b32.xlu0 %v774_v54, %s2540_s2 }
 0x147   : > { %752 = vrot.lane.b32.xlu1 %v723_v5, %s2541_s14  ;;  %750 = vrot.lane.b32.xlu0 %v711_v11, %s2541_s14 }
 0x14b   : > { %803 = vrot.lane.b32.xlu1 %v783_v16, %s2540_s2  ;;  %801 = vrot.lane.b32.xlu0 %v780_v20, %s2540_s2 }
 0x14f   : > { %805 = vrot.lane.b32.xlu1 %v786_v23, %s2540_s2  ;;  %754 = vrot.lane.b32.xlu0 %v735_v25, %s2541_s14  ;;  %s2289_s2 = scalar_lea.vmem %s3316_s20, 1024 }
 0x150   : > { %p2290_p12 = scmp.ne.s32.totalorder %s3316_s20, %s2289_s2  ;;  %p2297_p8 = scmp.lt.s32.totalorder %s2295_s27, %s2289_s2 }
 0x152   : > { %p2291_p13 = pnand %p2290_p12, %p3630_p11  ;;  %p2298_p2 = por %p2297_p8, %p2296_p4 }
 0x154   : > { %p2292_p0 = pneg %p2291_p13 }
 0x156   : > { %p2299_p5 = pnand %p2298_p2, %p2292_p0 }
 0x195   : > { %v739_v27 = vpop.permute.xlu0 %738 }
 0x196   : > { %v811_v35 = vsel %vm807_vm6, %v3049_v7, %v739_v27 }
 0x19d   : > { %v788_v26 = vpop.permute.xlu1 %787 }
 0x1a1   : > { %v741_v28 = vpop.permute.xlu1 %740  ;;  %v737_v30 = vpop.permute.xlu0 %736 }
 0x1a2   : > { %v809_v31 = vsel %vm807_vm6, %v3051_v8, %v737_v30  ;;  %v813_v33 = vsel %vm807_vm6, %v3057_v13, %v741_v28 }
 0x1a3   : > { %v830_v32 = vsel %vm828_vm5, %v809_v31, %v788_v26 }
 0x1a4   : > { %1844 = vmatprep.mubr.msk.bf16.mxu0 %vm859_vm7, %v830_v32 }
 0x1a5   : > { %v792_v34 = vpop.permute.xlu1 %791  ;;  %v790_v36 = vpop.permute.xlu0 %789 }
 0x1a6   : > { %v832_v37 = vsel %vm828_vm5, %v811_v35, %v790_v36  ;;  %v834_v38 = vsel %vm828_vm5, %v813_v33, %v792_v34 }
 0x1a7   : > { %1826 = vmatprep.mubr.msk.bf16.mxu1 %vm859_vm7, %v832_v37  ;;  %1845 = vmatmul.mubr.msk.bf16.vlgmr.msra.gmra.mrb[0].mxu0 %vm859_vm7, %v832_v37 }
 0x1a8   : > { %1827 = vmatmul.mubr.msk.bf16.vlgmr.msra.gmra.mrb[0].mxu1 %vm859_vm7, %v834_v38  ;;  %1848 = vmatprep.mubr.msk.bf16.mxu0 %vm859_vm7, %v834_v38 }
 0x1a9   : > { %v745_v8 = vpop.permute.xlu1 %744  ;;  %1879 = vmatpush3.bf16.msra.mxu1 %v985_v0  ;;  %1861 = vmatpush3.bf16.msra.mxu0 %v1095_v10  ;;  %v743_v13 = vpop.permute.xlu0 %742 }
 0x1aa   : > { %v817_v7 = vsel %vm807_vm6, %v3067_v24, %v745_v8  ;;  %v815_v40 = vsel %vm807_vm6, %v3071_v29, %v743_v13 }
 0x1ad   : > { %v796_v39 = vpop.permute.xlu1 %795  ;;  %v794_v41 = vpop.permute.xlu0 %793 }
 0x1ae   : > { %v836_v43 = vsel %vm828_vm5, %v815_v40, %v794_v41  ;;  %v838_v44 = vsel %vm828_vm5, %v817_v7, %v796_v39 }
 0x1af   : > { %1830 = vmatprep.mubr.msk.bf16.mxu1 %vm859_vm7, %v836_v43  ;;  %1849 = vmatmul.mubr.msk.bf16.gmra.mrb[4].mxu0 %vm859_vm7, %v836_v43 }
 0x1b0   : > { %1831 = vmatmul.mubr.msk.bf16.gmra.mrb[4].mxu1 %vm859_vm7, %v838_v44  ;;  %1862 = vmatprep.mubr.msk.bf16.mxu0 %vm859_vm7, %v834_v38 }
 0x1b1   : > { %v749_v45 = vpop.permute.xlu1 %748  ;;  %v747_v46 = vpop.permute.xlu0 %746 }
 0x1b2   : > { %v821_v24 = vsel %vm807_vm6, %v3079_v42, %v749_v45  ;;  %v819_v29 = vsel %vm807_vm6, %v3100_v61, %v747_v46 }
 0x1b5   : > { %v800_v47 = vpop.permute.xlu1 %799  ;;  %v798_v48 = vpop.permute.xlu0 %797 }
 0x1b6   : > { %v840_v49 = vsel %vm828_vm5, %v819_v29, %v798_v48  ;;  %v842_v50 = vsel %vm828_vm5, %v821_v24, %v800_v47 }
 0x1b7   : > { %1834 = vmatprep.mubr.msk.bf16.mxu1 %vm859_vm7, %v840_v49  ;;  %1863 = vmatmul.mubr.msk.bf16.vlgmr.msra.gmra.mrb[0].mxu0 %vm859_vm7, %v836_v43 }
 0x1b8   : > { %1835 = vmatmul.mubr.msk.bf16.gmra.mrb[8].mxu1 %vm859_vm7, %v842_v50  ;;  %1866 = vmatprep.mubr.msk.bf16.mxu0 %vm859_vm7, %v838_v44 }
 0x1b9   : > { %v753_v52 = vpop.permute.xlu1 %752  ;;  %v751_v53 = vpop.permute.xlu0 %750 }
 0x1ba   : > { %v825_v42 = vsel %vm807_vm6, %v3105_v4, %v753_v52  ;;  %v823_v61 = vsel %vm807_vm6, %v3116_v19, %v751_v53 }
 0x1bd   : > { %v804_v54 = vpop.permute.xlu1 %803  ;;  %v802_v55 = vpop.permute.xlu0 %801 }
 0x1be   : > { %v844_v56 = vsel %vm828_vm5, %v823_v61, %v802_v55  ;;  %v846_v57 = vsel %vm828_vm5, %v825_v42, %v804_v54 }
 0x1bf   : > { %1838 = vmatprep.mubr.msk.bf16.mxu1 %vm859_vm7, %v844_v56  ;;  %1867 = vmatmul.mubr.msk.bf16.gmra.mrb[4].mxu0 %vm859_vm7, %v840_v49 }
 0x1c0   : > { %1839 = vmatmul.mubr.msk.bf16.gmra.mrb[12].mxu1 %vm859_vm7, %v846_v57  ;;  %1870 = vmatprep.mubr.msk.bf16.mxu0 %vm859_vm7, %v842_v50 }
 0x1c1   : > { %1852 = vmatprep.mubr.msk.bf16.mxu1 %vm859_vm7, %v838_v44  ;;  %v755_v4 = vpop.permute.xlu0 %754  ;;  %v806_v58 = vpop.permute.xlu1 %805 }
 0x1c2   : > { %v827_v19 = vsel %vm807_vm6, %v3153_v51, %v755_v4 }
 0x1c3   : > { %v848_v59 = vsel %vm828_vm5, %v827_v19, %v806_v58 }
 0x1c7   : > { %1871 = vmatmul.mubr.msk.bf16.gmra.mrb[8].mxu0 %vm859_vm7, %v844_v56 }
 0x1c8   : > { %1853 = vmatmul.mubr.msk.bf16.vlgmr.msra.gmra.mrb[8].mxu1 %vm859_vm7, %v840_v49  ;;  %1874 = vmatprep.mubr.msk.bf16.mxu0 %vm859_vm7, %v846_v57 }
 0x1c9   : > { %1856 = vmatprep.mubr.msk.bf16.mxu1 %vm859_vm7, %v842_v50 }
 0x1cf   : > { %1875 = vmatmul.mubr.msk.bf16.gmra.mrb[12].mxu0 %vm859_vm7, %v848_v59 }
 0x1d0   : > { %1857 = vmatmul.mubr.msk.bf16.gmra.mrb[12].mxu1 %vm859_vm7, %v844_v56 }
 0x27b   : > { %v1828_v60 = vpop.f32.mrb[0].mxu1 }
 0x27c   : > { %v914_v62 = vpop.f32.mrb[1].mxu1 }
 0x27d   : > { %v1829_v63 = vpop.f32.mrb[2].mxu1 }
 0x27e   : > { %v917_v0 = vpop.f32.mrb[3].mxu1 }
 0x283   : > { %v1832_v1 = vpop.f32.mrb[4].mxu1 }
 0x284   : > { %v930_v2 = vpop.f32.mrb[5].mxu1 }
 0x285   : > { %v1833_v3 = vpop.f32.mrb[6].mxu1 }
 0x286   : > { %v933_v5 = vpop.f32.mrb[7].mxu1 }
 0x28a   : > { %v1864_v6 = vpop.f32.mrb[0].mxu0 }
 0x28b   : > { %v1880_v51 = vadd.f32 %v1864_v6, %v1828_v60  ;;  %v1131_v10 = vpop.f32.mrb[1].mxu0 }
 0x28c   : > { %v1881_v11 = vadd.f32 %v1131_v10, %v914_v62  ;;  %v1865_v12 = vpop.f32.mrb[2].mxu0 }
 0x28d   : > { %v1219_v14 = vadd.f32 %v1880_v51, %v3241_v9  ;;  %v1882_v15 = vadd.f32 %v1865_v12, %v1829_v63  ;;  %v1134_v16 = vpop.f32.mrb[3].mxu0 }
 0x28e   : > { %v1217_v17 = vadd.f32 %v1881_v11, %v3241_v9  ;;  %v1883_v18 = vadd.f32 %v1134_v16, %v917_v0 }
 0x28f   : > { %v1782_v20 = vpack.c.bf16 %v1219_v14, %v1219_v14  ;;  %v1220_v21 = vadd.f32 %v1882_v15, %v3241_v9  ;;  %v1355_v26 = vmul.f32 %v1219_v14, %v1219_v14  ;;  %v1317_v38 = vsel %vm828_vm5, %v1219_v14, 0.0 }
 0x290   : > { %v1780_v22 = vpack.c.bf16 %v1217_v17, %v1217_v17  ;;  %v1353_v23 = vmul.f32 %v1217_v17, %v1217_v17  ;;  %v1218_v25 = vadd.f32 %v1883_v18, %v3241_v9  ;;  %v1314_v28 = vsel %vm828_vm5, %v1217_v17, 0.0 }
 0x291   : > { %1300 = vst.msk [vmem:[%s3248_s3 + $0x8] sm:$0xf] %vm1297_vm8, %v1782_v20  ;;  %v1783_v27 = vpack.c.bf16 %v1220_v21, %v1220_v21  ;;  %v1356_v34 = vmul.f32 %v1220_v21, %v1220_v21  ;;  %v1372_v46 = vsel %vm828_vm5, %v1355_v26, 0.0  ;;  %v1319_v29 = vsel %vm828_vm5, %v1220_v21, 0.0 }
 0x292   : > { %1298 = vst.msk [vmem:[%s3248_s3] sm:$0xf] %vm1297_vm8, %v1780_v22  ;;  %v1781_v30 = vpack.c.bf16 %v1218_v25, %v1218_v25  ;;  %v1315_v31 = vsel %vm828_vm5, %v1218_v25, 0.0  ;;  %v1354_v32 = vmul.f32 %v1218_v25, %v1218_v25  ;;  %v1868_v33 = vpop.f32.mrb[4].mxu0  ;;  %v1369_v8 = vsel %vm828_vm5, %v1353_v23, 0.0 }
 0x293   : > { %1301 = vst.msk [vmem:[%s3248_s3 + $0xc] sm:$0xf] %vm1297_vm8, %v1783_v27  ;;  %v1316_v35 = vadd.f32 %v1315_v31, %v1314_v28  ;;  %v1884_v36 = vadd.f32 %v1868_v33, %v1832_v1  ;;  %v1147_v37 = vpop.f32.mrb[5].mxu0  ;;  %v1374_v48 = vsel %vm828_vm5, %v1356_v34, 0.0 }
 0x294   : > { %1299 = vst.msk [vmem:[%s3248_s3 + $0x4] sm:$0xf] %vm1297_vm8, %v1781_v30  ;;  %v1370_v13 = vsel %vm828_vm5, %v1354_v32, 0.0  ;;  %v1885_v7 = vadd.f32 %v1147_v37, %v930_v2  ;;  %v1869_v39 = vpop.f32.mrb[6].mxu0 }
 0x295   : > { %v1318_v40 = vadd.f32 %v1317_v38, %v1316_v35  ;;  %v1371_v41 = vadd.f32 %v1370_v13, %v1369_v8  ;;  %v1223_v43 = vadd.f32 %v1884_v36, %v3241_v9  ;;  %v1886_v44 = vadd.f32 %v1869_v39, %v1833_v3  ;;  %v1150_v45 = vpop.f32.mrb[7].mxu0 }
 0x296   : > { %v1221_v24 = vadd.f32 %v1885_v7, %v3241_v9  ;;  %v1887_v47 = vadd.f32 %v1150_v45, %v933_v5 }
 0x297   : > { %v1373_v49 = vadd.f32 %v1372_v46, %v1371_v41  ;;  %v1786_v50 = vpack.c.bf16 %v1223_v43, %v1223_v43  ;;  %v1320_v53 = vadd.f32 %v1319_v29, %v1318_v40  ;;  %v1224_v55 = vadd.f32 %v1886_v44, %v3241_v9 }
 0x298   : > { %v1784_v52 = vpack.c.bf16 %v1221_v24, %v1221_v24  ;;  %v1321_v42 = vsel %vm828_vm5, %v1221_v24, 0.0  ;;  %v1357_v54 = vmul.f32 %v1221_v24, %v1221_v24  ;;  %v1222_v56 = vadd.f32 %v1887_v47, %v3241_v9 }
 0x299   : > { %1304 = vst.msk [vmem:[%s3248_s3 + $0x18] sm:$0xf] %vm1297_vm8, %v1786_v50  ;;  %v1375_v61 = vadd.f32 %v1374_v48, %v1373_v49  ;;  %v1322_v57 = vadd.f32 %v1321_v42, %v1320_v53  ;;  %v1359_v58 = vmul.f32 %v1223_v43, %v1223_v43  ;;  %v1787_v60 = vpack.c.bf16 %v1224_v55, %v1224_v55 }
 0x29a   : > { %1302 = vst.msk [vmem:[%s3248_s3 + $0x10] sm:$0xf] %vm1297_vm8, %v1784_v52  ;;  %v1376_v4 = vsel %vm828_vm5, %v1357_v54, 0.0  ;;  %v1872_v19 = vpop.f32.mrb[8].mxu0  ;;  %v1785_v0 = vpack.c.bf16 %v1222_v56, %v1222_v56  ;;  %v1323_v1 = vsel %vm828_vm5, %v1222_v56, 0.0  ;;  %v1358_v2 = vmul.f32 %v1222_v56, %v1222_v56 }
 0x29b   : > { %v1377_v59 = vadd.f32 %v1376_v4, %v1375_v61  ;;  %v1854_v62 = vpop.f32.mrb[8].mxu1  ;;  %v1163_v63 = vpop.f32.mrb[9].mxu0  ;;  %v1325_v51 = vsel %vm828_vm5, %v1223_v43, 0.0  ;;  %1305 = vst.msk [vmem:[%s3248_s3 + $0x1c] sm:$0xf] %vm1297_vm8, %v1787_v60  ;;  %v1324_v10 = vadd.f32 %v1323_v1, %v1322_v57  ;;  %v1360_v15 = vmul.f32 %v1224_v55, %v1224_v55 }
 0x29c   : > { %v1888_v3 = vadd.f32 %v1872_v19, %v1854_v62  ;;  %v1053_v5 = vpop.f32.mrb[9].mxu1  ;;  %v1873_v6 = vpop.f32.mrb[10].mxu0  ;;  %1303 = vst.msk [vmem:[%s3248_s3 + $0x14] sm:$0xf] %vm1297_vm8, %v1785_v0  ;;  %v1378_v16 = vsel %vm828_vm5, %v1358_v2, 0.0  ;;  %v1380_v26 = vsel %vm828_vm5, %v1359_v58, 0.0 }
 0x29d   : > { %v1889_v11 = vadd.f32 %v1163_v63, %v1053_v5  ;;  %v1855_v12 = vpop.f32.mrb[10].mxu1  ;;  %v1166_v14 = vpop.f32.mrb[11].mxu0  ;;  %v1326_v21 = vadd.f32 %v1325_v51, %v1324_v10  ;;  %v1379_v22 = vadd.f32 %v1378_v16, %v1377_v59  ;;  %v1327_v27 = vsel %vm828_vm5, %v1224_v55, 0.0 }
 0x29e   : > { %v1227_v17 = vadd.f32 %v1888_v3, %v3241_v9  ;;  %v1890_v18 = vadd.f32 %v1873_v6, %v1855_v12  ;;  %v1056_v20 = vpop.f32.mrb[11].mxu1  ;;  %v1382_v35 = vsel %vm828_vm5, %v1360_v15, 0.0 }
 0x29f   : > { %v1225_v23 = vadd.f32 %v1889_v11, %v3241_v9  ;;  %v1891_v25 = vadd.f32 %v1166_v14, %v1056_v20  ;;  %v1381_v31 = vadd.f32 %v1380_v26, %v1379_v22  ;;  %v1328_v33 = vadd.f32 %v1327_v27, %v1326_v21 }
 0x2a0   : > { %v1790_v28 = vpack.c.bf16 %v1227_v17, %v1227_v17  ;;  %v1228_v30 = vadd.f32 %v1890_v18, %v3241_v9  ;;  %v1363_v46 = vmul.f32 %v1227_v17, %v1227_v17  ;;  %v1333_v61 = vsel %vm828_vm5, %v1227_v17, 0.0 }
 0x2a1   : > { %v1788_v32 = vpack.c.bf16 %v1225_v23, %v1225_v23  ;;  %v1329_v34 = vsel %vm828_vm5, %v1225_v23, 0.0  ;;  %v1361_v36 = vmul.f32 %v1225_v23, %v1225_v23  ;;  %v1383_v13 = vadd.f32 %v1382_v35, %v1381_v31 }
 0x2a2   : > { %1308 = vst.msk [vmem:[%s3248_s3 + $0x28] sm:$0xf] %vm1297_vm8, %v1790_v28  ;;  %v1791_v37 = vpack.c.bf16 %v1228_v30, %v1228_v30  ;;  %v1876_v38 = vpop.f32.mrb[12].mxu0  ;;  %v1330_v8 = vadd.f32 %v1329_v34, %v1328_v33  ;;  %v1226_v7 = vadd.f32 %v1891_v25, %v3241_v9  ;;  %v1364_v57 = vmul.f32 %v1228_v30, %v1228_v30 }
 0x2a3   : > { %1306 = vst.msk [vmem:[%s3248_s3 + $0x20] sm:$0xf] %vm1297_vm8, %v1788_v32  ;;  %v1858_v39 = vpop.f32.mrb[12].mxu1  ;;  %v1179_v40 = vpop.f32.mrb[13].mxu0  ;;  %v1384_v41 = vsel %vm828_vm5, %v1361_v36, 0.0  ;;  %v1335_v59 = vsel %vm828_vm5, %v1228_v30, 0.0 }
 0x2a4   : > { %1309 = vst.msk [vmem:[%s3248_s3 + $0x2c] sm:$0xf] %vm1297_vm8, %v1791_v37  ;;  %v1892_v43 = vadd.f32 %v1876_v38, %v1858_v39  ;;  %v1069_v44 = vpop.f32.mrb[13].mxu1  ;;  %v1877_v45 = vpop.f32.mrb[14].mxu0  ;;  %v1385_v24 = vadd.f32 %v1384_v41, %v1383_v13  ;;  %v1789_v47 = vpack.c.bf16 %v1226_v7, %v1226_v7  ;;  %v1331_v29 = vsel %vm828_vm5, %v1226_v7, 0.0 }
 0x2a5   : > { %v1859_v48 = vpop.f32.mrb[14].mxu1  ;;  %v1182_v49 = vpop.f32.mrb[15].mxu0  ;;  %v1332_v50 = vadd.f32 %v1331_v29, %v1330_v8  ;;  %v1362_v52 = vmul.f32 %v1226_v7, %v1226_v7  ;;  %v1893_v42 = vadd.f32 %v1179_v40, %v1069_v44  ;;  %v1388_v0 = vsel %vm828_vm5, %v1363_v46, 0.0 }
 0x2a6   : > { %v1231_v53 = vadd.f32 %v1892_v43, %v3241_v9  ;;  %v1072_v54 = vpop.f32.mrb[15].mxu1  ;;  %1307 = vst.msk [vmem:[%s3248_s3 + $0x24] sm:$0xf] %vm1297_vm8, %v1789_v47  ;;  %v1894_v55 = vadd.f32 %v1877_v45, %v1859_v48  ;;  %v1390_v51 = vsel %vm828_vm5, %v1364_v57, 0.0 }
 0x2a7   : > { %v1895_v56 = vadd.f32 %v1182_v49, %v1072_v54  ;;  %v1334_v4 = vadd.f32 %v1333_v61, %v1332_v50  ;;  %v1386_v19 = vsel %vm828_vm5, %v1362_v52, 0.0  ;;  %v1229_v62 = vadd.f32 %v1893_v42, %v3241_v9 }
 0x2a8   : > { %v1794_v58 = vpack.c.bf16 %v1231_v53, %v1231_v53  ;;  %v1387_v60 = vadd.f32 %v1386_v19, %v1385_v24  ;;  %v1232_v63 = vadd.f32 %v1894_v55, %v3241_v9  ;;  %v1367_v16 = vmul.f32 %v1231_v53, %v1231_v53 }
 0x2a9   : > { %v1336_v1 = vadd.f32 %v1335_v59, %v1334_v4  ;;  %v1230_v2 = vadd.f32 %v1895_v56, %v3241_v9  ;;  %v1792_v5 = vpack.c.bf16 %v1229_v62, %v1229_v62  ;;  %v1337_v6 = vsel %vm828_vm5, %v1229_v62, 0.0 }
 0x2aa   : > { %1312 = vst.msk [vmem:[%s3248_s3 + $0x38] sm:$0xf] %vm1297_vm8, %v1794_v58  ;;  %v1389_v3 = vadd.f32 %v1388_v0, %v1387_v60  ;;  %v1365_v11 = vmul.f32 %v1229_v62, %v1229_v62  ;;  %v1795_v12 = vpack.c.bf16 %v1232_v63, %v1232_v63  ;;  %v1341_v21 = vsel %vm828_vm5, %v1231_v53, 0.0 }
 0x2ab   : > { %v1338_v10 = vadd.f32 %v1337_v6, %v1336_v1  ;;  %1310 = vst.msk [vmem:[%s3248_s3 + $0x30] sm:$0xf] %vm1297_vm8, %v1792_v5  ;;  %v1793_v9 = vpack.c.bf16 %v1230_v2, %v1230_v2  ;;  %v1339_v15 = vsel %vm828_vm5, %v1230_v2, 0.0  ;;  %v1366_v20 = vmul.f32 %v1230_v2, %v1230_v2 }
 0x2ac   : > { %v1391_v14 = vadd.f32 %v1390_v51, %v1389_v3  ;;  %v1392_v17 = vsel %vm828_vm5, %v1365_v11, 0.0  ;;  %1313 = vst.msk [vmem:[%s3248_s3 + $0x3c] sm:$0xf] %vm1297_vm8, %v1795_v12  ;;  %v1368_v23 = vmul.f32 %v1232_v63, %v1232_v63 }
 0x2ad   : > { %v1340_v18 = vadd.f32 %v1339_v15, %v1338_v10  ;;  %1311 = vst.msk [vmem:[%s3248_s3 + $0x34] sm:$0xf] %vm1297_vm8, %v1793_v9  ;;  %v1394_v26 = vsel %vm828_vm5, %v1366_v20, 0.0 }
 0x2ae   : > { %v1393_v22 = vadd.f32 %v1392_v17, %v1391_v14 }
 0x2af   : > { %v1342_v25 = vadd.f32 %v1341_v21, %v1340_v18 }
 0x2b0   : > { %2302 = shalt.err (!%p2299_p5)
}
 0x2b1   : > { %s2303_s3 = scalar_lea.hbm %s3324_s1, 1024  ;;  %s2307_s15 = scalar_lea.hbm %s3629_s7, 4096 }
 0x2b2   : > { %p2304_p6 = scmp.ne.s32.totalorder %s3324_s1, %s2303_s3  ;;  %p2308_p9 = scmp.lt.u32.totalorder %s3324_s1, %s3629_s7 }
 0x2b3   : > { %p2309_p7 = scmp.lt.u32.totalorder %s2307_s15, %s2303_s3  ;;  %p2311_p12 = scmp.lt.u32.totalorder %s2303_s3, %s3324_s1 }
 0x2b4   : > { %p2305_p3 = pnand %p2304_p6, %p3630_p11 }
 0x2b5   : > { %p2310_p1 = por %p2309_p7, %p2308_p9 }
 0x2b6   : > { %p2306_p10 = pneg %p2305_p3 }
 0x2b7   : > { %p2312_p13 = por %p2311_p12, %p2310_p1 }
 0x2b9   : > { %p2313_p0 = pnand %p2312_p13, %p2306_p10 }
 0x2bb   : > { %2316 = shalt.err (!%p2313_p0)
}
 0x2bc   : > { %s2543_s2 = smov 64   ;;  %s3631_s0 = sld [smem:[#allocation22_spill]]  ;;  %v1343_v27 = vsel %vm828_vm5, %v1232_v63, 0.0  ;;  %v1395_v28 = vadd.f32 %v1394_v26, %v1393_v22  ;;  %v1396_v30 = vsel %vm828_vm5, %v1367_v16, 0.0  ;;  %v1398_v33 = vsel %vm828_vm5, %v1368_v23, 0.0 }
 0x2bd   : > { %1942 = dma.vmem_to_hbm [thread:$0]  (%p3630_p11), %s3316_s20, 1024, %s3324_s1, %s1408_s21, %s2543_s2, %s2543_s2, %s2541_s14   ;;  %v1344_v31 = vadd.f32 %v1343_v27, %v1342_v25  ;;  %vm1351_vm9 = vcmask 57344  }
 0x2be   : > { %v1397_v32 = vadd.f32 %v1396_v30, %v1395_v28  ;;  %s1774_s24 = sshll.u32 %s3628_s16, 1  ;;  %s3632_s21 = sld [smem:[#allocation32_spill]] }
 0x2bf   : > { %v1345_v34 = vrot.slane %v1344_v31, 4  ;;  %s1443_s22 = sadd.s32 %s3625_s6, %s1774_s24  ;;  %s3633_s29 = sld [smem:[#allocation47_spill]] }
 0x2c0   : > { %v1399_v35 = vadd.f32 %v1398_v33, %v1397_v32  ;;  %s1775_s14 = sshll.u32 %s1443_s22, 4  ;;  %s3635_s8 = sld [smem:[#allocation48_spill]] }
 0x2c1   : > { %v1346_v36 = vadd.f32 %v1345_v34, %v1344_v31  ;;  %s3384_s24 = scalar_lea.sflag [#allocation13], %s406_s25  ;;  %s2544_s16 = smov [#allocation12]  }
 0x2c2   : > { %s468_s28 = sand.u32 1, %s3631_s0   ;;  %v1400_v37 = vrot.slane %v1399_v35, 4  ;;  %s2321_s19 = sshll.u32 %s2544_s16, 4  ;;  %s2322_s19 = int_to_ptr.vmem [resolvable:$false] %s2321_s19 }
 0x2c3   : > { %v1347_v38 = vrot.slane %v1346_v36, 2  ;;  %s469_s20 = scalar_lea.vmem [#allocation12], %s468_s28  ;;  %s3364_s27 = scalar_lea.vmem [#allocation14], %s468_s28 }
 0x2c4   : > { %v1401_v8 = vadd.f32 %v1400_v37, %v1399_v35  ;;  %s1450_s1 = sshll.u32 %s469_s20, 4  ;;  %s1465_s3 = sshll.u32 %s3364_s27, 4  ;;  %s3372_s1 = int_to_ptr.vmem [resolvable:$true] %s1450_s1  ;;  %s3380_s3 = int_to_ptr.vmem [resolvable:$true] %s1465_s3 }
 0x2c5   : > { %v1348_v13 = vadd.f32 %v1347_v38, %v1346_v36  ;;  %s3634_s2 = smov %s3633_s29  ;;  %s3370_s6 = scalar_lea.hbm %s3633_s29, %s1775_s14 }
 0x2c6   : > { %v1402_v7 = vrot.slane %v1401_v8, 2  ;;  %s3636_s0 = smov %s3635_s8  ;;  %s3378_s28 = scalar_lea.hbm %s3635_s8, %s1775_s14 }
 0x2c7   : > { %v1349_v39 = vrot.slane %v1348_v13, 1  ;;  %s2317_s22 = scalar_lea.vmem %s3372_s1, 16  ;;  %p3637_p4 = scmp.ne.s32.totalorder %s3632_s21, 0 }
 0x2c8   : > { %v1403_v40 = vadd.f32 %v1402_v7, %v1401_v8  ;;  %p2318_p11 = scmp.ne.s32.totalorder %s3372_s1, %s2317_s22  ;;  %s2323_s29 = scalar_lea.vmem %s2322_s19, 32 }
 0x2c9   : > { %v1350_v41 = vadd.f32 %v1349_v39, %v1348_v13  ;;  %p2324_p5 = scmp.lt.s32.totalorder %s3372_s1, %s2322_s19  ;;  %p2325_p6 = scmp.lt.s32.totalorder %s2323_s29, %s2317_s22 }
 0x2ca   : > { %v1404_v43 = vrot.slane %v1403_v40, 1  ;;  %p2319_p8 = pnand %p2318_p11, %p3637_p4 }
 0x2cb   : > { %1352 = vst.msk [vmem:[%s469_s20] sm:$0x1] %vm1351_vm9, %v1350_v41  ;;  %p2326_p3 = por %p2325_p6, %p2324_p5 }
 0x2cc   : > { %p2320_p2 = pneg %p2319_p8 }
 0x2ce   : > { %p2327_p10 = pnand %p2326_p3, %p2320_p2 }
 0x2d0   : > { %2330 = shalt.err (!%p2327_p10)
}
 0x2d1   : > { %s2331_s18 = scalar_lea.hbm %s3370_s6, 16  ;;  %s2335_s20 = scalar_lea.hbm %s3634_s2, 64 }
 0x2d2   : > { %p2332_p9 = scmp.ne.s32.totalorder %s3370_s6, %s2331_s18  ;;  %p2336_p12 = scmp.lt.u32.totalorder %s3370_s6, %s3634_s2 }
 0x2d3   : > { %p2337_p13 = scmp.lt.u32.totalorder %s2335_s20, %s2331_s18  ;;  %p2339_p11 = scmp.lt.u32.totalorder %s2331_s18, %s3370_s6 }
 0x2d4   : > { %p2333_p7 = pnand %p2332_p9, %p3637_p4 }
 0x2d5   : > { %p2338_p0 = por %p2337_p13, %p2336_p12 }
 0x2d6   : > { %p2334_p1 = pneg %p2333_p7 }
 0x2d7   : > { %p2340_p8 = por %p2339_p11, %p2338_p0 }
 0x2d9   : > { %p2341_p2 = pnand %p2340_p8, %p2334_p1 }
 0x2db   : > { %2344 = shalt.err (!%p2341_p2)
}
 0x2dc   : > { %1943 = dma.vmem_to_hbm [thread:$0]  (%p3637_p4), %s3372_s1, 16, %s3370_s6, %s3384_s24   ;;  %v1405_v44 = vadd.f32 %v1404_v43, %v1403_v40 }
 0x2dd   : > { %s2345_s8 = scalar_lea.vmem %s3380_s3, 16  ;;  %s2545_s22 = smov [#allocation14]  }
 0x2de   : > { %1406 = vst.msk [vmem:[%s3364_s27] sm:$0x1] %vm1351_vm9, %v1405_v44  ;;  %p2346_p5 = scmp.ne.s32.totalorder %s3380_s3, %s2345_s8  ;;  %s2349_s16 = sshll.u32 %s2545_s22, 4  ;;  %s2350_s16 = int_to_ptr.vmem [resolvable:$false] %s2349_s16 }
 0x2df   : > { %s2351_s19 = scalar_lea.vmem %s2350_s16, 32  ;;  %p2352_p10 = scmp.lt.s32.totalorder %s3380_s3, %s2350_s16 }
 0x2e0   : > { %p2347_p6 = pnand %p2346_p5, %p3637_p4  ;;  %p2353_p9 = scmp.lt.s32.totalorder %s2351_s19, %s2345_s8 }
 0x2e2   : > { %p2348_p3 = pneg %p2347_p6  ;;  %p2354_p7 = por %p2353_p9, %p2352_p10 }
 0x2e4   : > { %p2355_p1 = pnand %p2354_p7, %p2348_p3 }
 0x2e6   : > { %2358 = shalt.err (!%p2355_p1)
}
 0x2e7   : > { %s2359_s1 = scalar_lea.hbm %s3378_s28, 16  ;;  %s2363_s29 = scalar_lea.hbm %s3636_s0, 64 }
 0x2e8   : > { %p2360_p12 = scmp.ne.s32.totalorder %s3378_s28, %s2359_s1  ;;  %p2364_p11 = scmp.lt.u32.totalorder %s3378_s28, %s3636_s0 }
 0x2e9   : > { %p2365_p8 = scmp.lt.u32.totalorder %s2363_s29, %s2359_s1  ;;  %p2367_p5 = scmp.lt.u32.totalorder %s2359_s1, %s3378_s28 }
 0x2ea   : > { %p2361_p13 = pnand %p2360_p12, %p3637_p4 }
 0x2eb   : > { %p2366_p2 = por %p2365_p8, %p2364_p11 }
 0x2ec   : > { %p2362_p0 = pneg %p2361_p13 }
 0x2ed   : > { %p2368_p6 = por %p2367_p5, %p2366_p2 }
 0x2ef   : > { %p2369_p3 = pnand %p2368_p6, %p2362_p0 }
 0x2f1   : > { %2372 = shalt.err (!%p2369_p3)
}
 0x2f2   : > { %1944 = dma.vmem_to_hbm [thread:$0]  (%p3637_p4), %s3380_s3, 16, %s3378_s28, %s3384_s24  }
 0x2f3 PF: > { %p1980_p10 = scmp.ge.s32.totalorder %s2531_s17, 2  ;;  %s1477_s14 = sand.u32 1, %s2503_s10  }
 0x2f4   : > { %p3638_p9 = scmp.ne.s32.totalorder %s3597_s5, 0  ;;  %s1478_s20 = scalar_lea.sflag [#allocation4], %s1477_s14 }
 0x2f6   : > { %p1966_p7 = pnand %p1980_p10, %p3638_p9 }
 0x2f8   : > { %2458 = dma.done.wait (!%p1966_p7), %s1478_s20, 1024  }
 0x2f9   : > { %2460 = vsyncadd (!%p1966_p7), %s1478_s20, 4294966272  ;;  %s3639_s15 = sadd.s32 4294967294, %s2531_s17   ;;  %p3640_p1 = scmp.ne.s32.totalorder %s3599_s13, 0 }
 0x2fa   : > { %s1486_s30 = sand.u32 1, %s3639_s15  }
 0x2fb   : > { %p1969_p12 = pnand %p1980_p10, %p3640_p1  ;;  %s1487_s21 = scalar_lea.sflag [#allocation13], %s1486_s30 }
 0x2fd   : > { %2462 = dma.done.wait (!%p1969_p12), %s1487_s21, 32  }
 0x2fe   : > { %2464 = vsyncadd (!%p1969_p12), %s1487_s21, 4294967264  ;;  %s31_s17 = sadd.s32 1, %s2531_s17   ;;  %s3642_s24 = sld [smem:[#allocation22_spill]] }
 0x2ff   : > { %p3441_p4 = scmp.ge.s32.totalorder %s31_s17, 6   ;;  %s3643_s27 = sld [smem:[#allocation24_spill]] }
 0x300   : > { %s3644_s28 = sld [smem:[#allocation25_spill]]  ;;  %s3645_s30 = sld [smem:[#allocation26_spill]] }
 0x301   : > { %s3646_s10 = sld [smem:[#allocation39_spill]]  ;;  %s3647_s5 = sld [smem:[#allocation27_spill]] }
 0x302   : > { %s3648_s13 = sld [smem:[#allocation40_spill]]  ;;  %s3649_s22 = sld [smem:[#allocation30_spill]] }
 0x303   : > { %s3650_s14 = sld [smem:[#allocation31_spill]]  ;;  %s3651_s15 = sld [smem:[#allocation34_spill]] }
 0x304   : > { %s3652_s16 = sld [smem:[#allocation35_spill]]  ;;  %s3653_s25 = smov %s2475_s26 }
 0x305   : > { %s3654_s26 = smov %s2789_s23  ;;  %s3655_s29 = smov %s3677_s12 }
 0x306   : > { %s3656_s8 = smov %s2499_s9  ;;  %30 = sbr.rel (!%p3441_p4) target bundleno = 26 (0x1a), region = 151 }
 0x307   : > { %s3657_s9 = smov %s3646_s10  ;;  %s3658_s10 = smov %s2507_s11 }
 0x308   : > { %s3659_s11 = smov %s3647_s5  ;;  %s3660_s12 = smov %s3648_s13 }
 0x309   : > { %s3661_s13 = smov %s3649_s22 }
 0x30d   :  { %1499 = vsyncpa [#allocation3], 1 }
 0x30e   :  { %1501 = vsyncpa [#allocation3 + $0x1], 1 }
 0x30f   :  { %1502 = vsyncpa [#allocation6], 1 }
 0x310   :  { %1504 = vsyncpa [#allocation6 + $0x1], 1 }
 0x311   :  { %1505 = vsyncpa [#allocation9], 1 }
 0x312   :  { %1506 = vsyncpa [#allocation4], 1 }
 0x313   :  { %1508 = vsyncpa [#allocation4 + $0x1], 1 }
 0x314   :  { %1509 = vsyncpa [#allocation13], 1 }
 0x315   :  { %1511 = vsyncpa [#allocation13 + $0x1], 1 }

</bundles_post_ra>
